<compile_context>
chip_gen: v7x
topology: tpu7x:2x2x1
jax: 0.10.0
libtpu: 0.0.40
codegen_flags: <defaults>
</compile_context>

<pallas_src>
import functools

import numpy as np
import jax
import jax.numpy as jnp
from jax import lax
from jax.experimental import pallas as pl
from jax.experimental.pallas import tpu as pltpu


# ----------------------------- host-side constant pool operators -----------------------------
def _pool_left_np(out_n, in_n, k):
    # (out_n, in_n): left-multiply averages groups of k consecutive rows.
    op = np.zeros((out_n, in_n), np.float32)
    for i in range(out_n):
        op[i, i * k:(i + 1) * k] = 1.0 / k
    return op


def _pool_right_np(in_n, out_n, k):
    # (in_n, out_n): right-multiply averages groups of k consecutive columns.
    return np.ascontiguousarray(_pool_left_np(out_n, in_n, k).T)


def _pick_block_batch(batch, slab_bytes, budget_bytes):
    # Largest divisor of `batch` whose 3-input x 2-buffer footprint fits the budget.
    best = 1
    for d in range(1, batch + 1):
        if batch % d == 0 and 6 * d * slab_bytes <= budget_bytes:
            best = d
    return best


# ------------------------------------------ kernel -------------------------------------------
def _zero_dce_kernel(p4h_ref, p4w_ref, p16h_ref, p16w_ref,
                     ill_ref, inp_ref, res_ref, o_ref, *, total_b):
    """Processes one (Bb, C, H, W) block (Bb images of one scale).

    Each grid step writes its own (1, 1, 8, 128) output block (scalar broadcast), so both
    grid axes are parallel; the wrapper sums out[..., 0, 0].  All /B normalisation is folded
    in here (total_b = full per-scale batch).
    """
    Bb, C, H, W = ill_ref.shape
    Hp, Wp = H // 4, W // 4          # L_spa: AvgPool2d(4)
    He, We = Hp // 4, Wp // 4        # L_exp: AvgPool2d(16) == 4x4 pool of the 4x4 pool
    f32 = jnp.float32
    mm = functools.partial(jnp.dot, preferred_element_type=f32)

    # Constant pooling operators (hoisted to the wrapper; DMA'd once, block index never changes).
    p4h = p4h_ref[...]               # (Hp, H)
    p4w = p4w_ref[...]               # (W, Wp)
    p16h = p16h_ref[...]             # (He, Hp)
    p16w = p16w_ref[...]             # (Wp, We)

    inv_b = 1.0 / total_b

    def per_image(b, acc):
        # ------ single pass over the C=3 planes: TV on ill, channel sums, colour means ------
        h_tv = jnp.zeros((), f32)
        w_tv = jnp.zeros((), f32)
        org_sum = jnp.zeros((H, W), f32)     # sum over channels of res ("org")
        enh_sum = jnp.zeros((H, W), f32)     # sum over channels of inp ("enhance")
        ch_mean = []                         # per-channel spatial means of res (L_color)
        for c in range(C):
            ill_c = ill_ref[b, c].astype(f32)   # (H, W) plane
            inp_c = inp_ref[b, c].astype(f32)
            res_c = res_ref[b, c].astype(f32)
            dh = ill_c[1:, :] - ill_c[:-1, :]
            dw = ill_c[:, 1:] - ill_c[:, :-1]
            h_tv = h_tv + jnp.sum(dh * dh)
            w_tv = w_tv + jnp.sum(dw * dw)
            org_sum = org_sum + res_c
            enh_sum = enh_sum + inp_c
            ch_mean.append(jnp.mean(res_c))

        # ---------------- L_TV on the illumination map (weight 200) --------------------------
        loss_tv = 200.0 * 2.0 * (h_tv / ((H - 1) * W) + w_tv / (H * (W - 1)))

        org_mean = org_sum * (1.0 / C)               # channel mean of res
        diff_mean = (org_sum - enh_sum) * (1.0 / C)  # org_mean - enhance_mean (pool is linear)

        # ---------------- 4x4 average pools via tiny constant matmuls (MXU) ------------------
        op4 = mm(p4h, mm(org_mean, p4w))     # pooled "org"         (Hp, Wp)
        q = mm(p4h, mm(diff_mean, p4w))      # pooled (org - enh)   (Hp, Wp)

        # ---------------- L_spa (weight 1): sum of the 4-neighbour E map ---------------------
        # sum((q - q_left)^2) = sum(dqw^2) + sum(q[:, 0]^2), etc.  No rolls / masks needed.
        dqh = q[1:, :] - q[:-1, :]
        dqw = q[:, 1:] - q[:, :-1]
        e_sum = (2.0 * (jnp.sum(dqh * dqh) + jnp.sum(dqw * dqw))
                 + jnp.sum(q[0:1, :] ** 2) + jnp.sum(q[Hp - 1:Hp, :] ** 2)
                 + jnp.sum(q[:, 0:1] ** 2) + jnp.sum(q[:, Wp - 1:Wp] ** 2))
        loss_spa = e_sum / (Hp * Wp)

        # ---------------- L_exp(16, 0.6) (weight 10): 16-pool derived from the 4-pool --------
        p16 = mm(p16h, mm(op4, p16w))        # (He, We)
        loss_exp = 10.0 * jnp.sum((p16 - 0.6) ** 2) / (He * We)

        # ---------------- L_color (weight 5) on res (C == 3) ---------------------------------
        mr, mg, mb = ch_mean[0], ch_mean[1], ch_mean[2]
        drg = (mr - mg) ** 2
        drb = (mr - mb) ** 2
        dgb = (mb - mg) ** 2
        loss_col = 5.0 * jnp.sqrt(drg * drg + drb * drb + dgb * dgb)

        return acc + inv_b * (loss_tv + loss_spa + loss_exp + loss_col)

    total = lax.fori_loop(0, Bb, per_image, jnp.zeros((), f32))
    o_ref[...] = jnp.zeros_like(o_ref) + total   # lane-dense (8,128) scalar broadcast


# ------------------------------------------ wrapper ------------------------------------------
def _zero_dce_group_loss(ill_flat, inp_flat, res_flat, *, num_scales, batch):
    """ill/inp/res: (S*B, C, H, W), scale-major flattened.  Returns scalar loss summed over S."""
    N, C, H, W = ill_flat.shape
    S, B = num_scales, batch
    assert N == S * B
    if C != 3:
        raise ValueError(f"L_color requires C == 3 channels, got C={C}")
    if H % 16 or W % 16:
        raise ValueError(f"H and W must be divisible by 16 (L_exp pool), got {(H, W)}")

    slab_bytes = C * H * W * jnp.dtype(ill_flat.dtype).itemsize
    Bb = _pick_block_batch(B, slab_bytes, budget_bytes=12 << 20)   # 3 inputs x 2 buffers cap
    NB = B // Bb

    Hp, Wp = H // 4, W // 4
    He, We = Hp // 4, Wp // 4
    p4h = jnp.asarray(_pool_left_np(Hp, H, 4))
    p4w = jnp.asarray(_pool_right_np(W, Wp, 4))
    p16h = jnp.asarray(_pool_left_np(He, Hp, 4))
    p16w = jnp.asarray(_pool_right_np(Wp, We, 4))

    def const_spec(shape):
        return pl.BlockSpec(shape, lambda s, nb: (0, 0))     # constant block, DMA'd once

    slab_spec = pl.BlockSpec((Bb, C, H, W), lambda s, nb: (s * NB + nb, 0, 0, 0))

    out = pl.pallas_call(
        functools.partial(_zero_dce_kernel, total_b=B),
        out_shape=jax.ShapeDtypeStruct((S, NB, 8, 128), jnp.float32),
        grid=(S, NB),
        in_specs=[const_spec(p4h.shape), const_spec(p4w.shape),
                  const_spec(p16h.shape), const_spec(p16w.shape),
                  slab_spec, slab_spec, slab_spec],
        out_specs=pl.BlockSpec((1, 1, 8, 128), lambda s, nb: (s, nb, 0, 0)),
        compiler_params=pltpu.CompilerParams(
            dimension_semantics=("parallel", "parallel"),
            vmem_limit_bytes=48 * 1024 * 1024),
    )(p4h, p4w, p16h, p16w, ill_flat, inp_flat, res_flat)
    return jnp.sum(out[:, :, 0, 0])


def zero_dce_loss(res_dict):
    """Mirrors ZeroDCELoss.forward with use_col=use_spa=use_exp=use_tv=True."""
    ill_list, inp_list, res_list = res_dict["ill"], res_dict["inp"], res_dict["res"]
    # Fuse same-shape (ill, inp, res) triples into one pallas_call per shape group.
    groups, order = {}, []
    for triple in zip(ill_list, inp_list, res_list):
        key = tuple(triple[0].shape)
        if key not in groups:
            groups[key] = []
            order.append(key)
        groups[key].append(triple)
    loss = jnp.float32(0.0)
    for key in order:
        triples = groups[key]
        S, B = len(triples), key[0]
        if S == 1:
            ill_f, inp_f, res_f = triples[0]          # no HBM round-trip for single scales
        else:
            ill_f = jnp.concatenate([t[0] for t in triples], axis=0)
            inp_f = jnp.concatenate([t[1] for t in triples], axis=0)
            res_f = jnp.concatenate([t[2] for t in triples], axis=0)
        loss = loss + _zero_dce_group_loss(ill_f, inp_f, res_f, num_scales=S, batch=B)
    return loss


# ----------------------------- pure-JAX reference (for checking) -----------------------------
def _reference_loss(res_dict):
    def avg_pool(x, k):  # x: (B, 1, H, W)
        b, c, h, w = x.shape
        return x.reshape(b, c, h // k, k, w // k, k).mean(axis=(3, 5))

    total = jnp.float32(0.0)
    for ill, inp, res in zip(res_dict["ill"], res_dict["inp"], res_dict["res"]):
        B, C, H, W = ill.shape
        # L_TV
        h_tv = jnp.sum((ill[:, :, 1:, :] - ill[:, :, :-1, :]) ** 2)
        w_tv = jnp.sum((ill[:, :, :, 1:] - ill[:, :, :, :-1]) ** 2)
        loss_tv = 200.0 * 2.0 * (h_tv / ((H - 1) * W) + w_tv / (H * (W - 1))) / B
        # L_spa
        om = res.mean(axis=1, keepdims=True)
        em = inp.mean(axis=1, keepdims=True)
        op, ep = avg_pool(om, 4), avg_pool(em, 4)

        def grads(p):
            pad = jnp.pad(p, ((0, 0), (0, 0), (1, 1), (1, 1)))
            c = pad[:, :, 1:-1, 1:-1]
            return (c - pad[:, :, 1:-1, :-2], c - pad[:, :, 1:-1, 2:],
                    c - pad[:, :, :-2, 1:-1], c - pad[:, :, 2:, 1:-1])

        E = sum((a - b) ** 2 for a, b in zip(grads(op), grads(ep)))
        loss_spa = jnp.mean(E)
        # L_exp
        pooled = avg_pool(om, 16)
        loss_exp = 10.0 * jnp.mean((pooled - 0.6) ** 2)
        # L_color
        mrgb = res.mean(axis=(2, 3))
        mr, mg, mb = mrgb[:, 0], mrgb[:, 1], mrgb[:, 2]
        k = jnp.sqrt(((mr - mg) ** 2) ** 2 + ((mr - mb) ** 2) ** 2 + ((mb - mg) ** 2) ** 2)
        loss_col = 5.0 * jnp.mean(k)
        total = total + loss_tv + loss_spa + loss_exp + loss_col
    return total


if __name__ == "__main__":
    key = jax.random.PRNGKey(0)
    B, C, H, W = 2, 3, 32, 32   # C=3 required by L_color; H, W divisible by 16 for L_exp pool
    n_scales = 2                # length of the ill/inp/res lists

    keys = jax.random.split(key, 3 * n_scales)
    ill_list = [jax.random.uniform(keys[i], (B, C, H, W), jnp.float32)
                for i in range(n_scales)]
    inp_list = [jax.random.uniform(keys[n_scales + i], (B, C, H, W), jnp.float32)
                for i in range(n_scales)]
    res_list = [jax.random.uniform(keys[2 * n_scales + i], (B, C, H, W), jnp.float32)
                for i in range(n_scales)]
    res_dict = {"ill": ill_list, "inp": inp_list, "res": res_list}

    loss = zero_dce_loss(res_dict)
    jax.block_until_ready(loss)

    ref = _reference_loss(res_dict)
    assert jnp.allclose(loss, ref, rtol=1e-2, atol=1e-2), (float(loss), float(ref))
    print("KERNEL_OK")
</pallas_src>

<mosaic_0001>
module attributes {stable_mosaic.version = 11 : i64} {
  func.func @_zero_dce_kernel(%arg0: i32, %arg1: i32, %arg2: memref<8x32xf32, #tpu.memory_space<vmem>>, %arg3: memref<32x8xf32, #tpu.memory_space<vmem>>, %arg4: memref<2x8xf32, #tpu.memory_space<vmem>>, %arg5: memref<8x2xf32, #tpu.memory_space<vmem>>, %arg6: memref<2x3x32x32xf32, #tpu.memory_space<vmem>>, %arg7: memref<2x3x32x32xf32, #tpu.memory_space<vmem>>, %arg8: memref<2x3x32x32xf32, #tpu.memory_space<vmem>>, %arg9: memref<1x1x8x128xf32, #tpu.memory_space<vmem>>) attributes {dimension_semantics = [#tpu.dimension_semantics<parallel>, #tpu.dimension_semantics<parallel>], iteration_bounds = array<i64: 2, 1>, scalar_prefetch = 0 : i64, scratch_operands = 0 : i64, tpu.core_type = #tpu.core_type<tc>, window_params = [{pipeline_mode = #tpu.pipeline_mode<synchronous>, transform_indices = @transform_0, window_bounds = array<i64: 8, 32>}, {pipeline_mode = #tpu.pipeline_mode<synchronous>, transform_indices = @transform_1, window_bounds = array<i64: 32, 8>}, {pipeline_mode = #tpu.pipeline_mode<synchronous>, transform_indices = @transform_2, window_bounds = array<i64: 2, 8>}, {pipeline_mode = #tpu.pipeline_mode<synchronous>, transform_indices = @transform_3, window_bounds = array<i64: 8, 2>}, {transform_indices = @transform_4, window_bounds = array<i64: 2, 3, 32, 32>}, {transform_indices = @transform_5, window_bounds = array<i64: 2, 3, 32, 32>}, {transform_indices = @transform_6, window_bounds = array<i64: 2, 3, 32, 32>}, {transform_indices = @transform_7, window_bounds = array<i64: 1, 1, 8, 128>}]} {
    %c0 = arith.constant 0 : index
    %c0_0 = arith.constant 0 : index
    %0 = vector.load %arg2[%c0, %c0_0] : memref<8x32xf32, #tpu.memory_space<vmem>>, vector<8x32xf32>
    %c0_1 = arith.constant 0 : index
    %c0_2 = arith.constant 0 : index
    %1 = vector.load %arg3[%c0_1, %c0_2] : memref<32x8xf32, #tpu.memory_space<vmem>>, vector<32x8xf32>
    %c0_3 = arith.constant 0 : index
    %c0_4 = arith.constant 0 : index
    %2 = vector.load %arg4[%c0_3, %c0_4] : memref<2x8xf32, #tpu.memory_space<vmem>>, vector<2x8xf32>
    %c0_5 = arith.constant 0 : index
    %c0_6 = arith.constant 0 : index
    %3 = vector.load %arg5[%c0_5, %c0_6] : memref<8x2xf32, #tpu.memory_space<vmem>>, vector<8x2xf32>
    %cst = arith.constant 0.000000e+00 : f32
    %c0_i32 = arith.constant 0 : i32
    %c2_i32 = arith.constant 2 : i32
    %4 = arith.addi %c0_i32, %c2_i32 : i32
    %c1_i32 = arith.constant 1 : i32
    %5 = scf.for %arg10 = %c0_i32 to %4 step %c1_i32 iter_args(%arg11 = %cst) -> (f32)  : i32 {
      %cst_13 = arith.constant 0.000000e+00 : f32
      %10 = vector.broadcast %cst_13 : f32 to vector<32x32xf32>
      %cst_14 = arith.constant 0.000000e+00 : f32
      %11 = vector.broadcast %cst_14 : f32 to vector<32x32xf32>
      %12 = arith.index_cast %arg10 : i32 to index
      %c0_15 = arith.constant 0 : index
      %c0_16 = arith.constant 0 : index
      %c0_17 = arith.constant 0 : index
      %13 = vector.load %arg6[%12, %c0_15, %c0_16, %c0_17] : memref<2x3x32x32xf32, #tpu.memory_space<vmem>>, vector<1x1x32x32xf32>
      %14 = vector.shape_cast %13 : vector<1x1x32x32xf32> to vector<32x32xf32>
      %15 = arith.index_cast %arg10 : i32 to index
      %c0_18 = arith.constant 0 : index
      %c0_19 = arith.constant 0 : index
      %c0_20 = arith.constant 0 : index
      %16 = vector.load %arg7[%15, %c0_18, %c0_19, %c0_20] : memref<2x3x32x32xf32, #tpu.memory_space<vmem>>, vector<1x1x32x32xf32>
      %17 = vector.shape_cast %16 : vector<1x1x32x32xf32> to vector<32x32xf32>
      %18 = arith.index_cast %arg10 : i32 to index
      %c0_21 = arith.constant 0 : index
      %c0_22 = arith.constant 0 : index
      %c0_23 = arith.constant 0 : index
      %19 = vector.load %arg8[%18, %c0_21, %c0_22, %c0_23] : memref<2x3x32x32xf32, #tpu.memory_space<vmem>>, vector<1x1x32x32xf32>
      %20 = vector.shape_cast %19 : vector<1x1x32x32xf32> to vector<32x32xf32>
      %21 = vector.extract_strided_slice %14 {offsets = [1, 0], sizes = [31, 32], strides = [1, 1]} : vector<32x32xf32> to vector<31x32xf32>
      %22 = vector.extract_strided_slice %14 {offsets = [0, 0], sizes = [31, 32], strides = [1, 1]} : vector<32x32xf32> to vector<31x32xf32>
      %23 = arith.subf %21, %22 : vector<31x32xf32>
      %24 = vector.extract_strided_slice %14 {offsets = [0, 1], sizes = [32, 31], strides = [1, 1]} : vector<32x32xf32> to vector<32x31xf32>
      %25 = vector.extract_strided_slice %14 {offsets = [0, 0], sizes = [32, 31], strides = [1, 1]} : vector<32x32xf32> to vector<32x31xf32>
      %26 = arith.subf %24, %25 : vector<32x31xf32>
      %27 = arith.mulf %23, %23 : vector<31x32xf32>
      %28 = vector.shape_cast %27 : vector<31x32xf32> to vector<1x31x32xf32>
      %cst_24 = arith.constant dense<0.000000e+00> : vector<1xf32>
      %29 = vector.multi_reduction <add>, %28, %cst_24 [1, 2] : vector<1x31x32xf32> to vector<1xf32>
      %30 = vector.shape_cast %29 : vector<1xf32> to vector<1x1x1xf32>
      %31 = vector.extract %30[0, 0, 0] : f32 from vector<1x1x1xf32>
      %cst_25 = arith.constant 0.000000e+00 : f32
      %32 = arith.addf %cst_25, %31 : f32
      %33 = arith.mulf %26, %26 : vector<32x31xf32>
      %34 = vector.shape_cast %33 : vector<32x31xf32> to vector<1x32x31xf32>
      %cst_26 = arith.constant dense<0.000000e+00> : vector<1xf32>
      %35 = vector.multi_reduction <add>, %34, %cst_26 [1, 2] : vector<1x32x31xf32> to vector<1xf32>
      %36 = vector.shape_cast %35 : vector<1xf32> to vector<1x1x1xf32>
      %37 = vector.extract %36[0, 0, 0] : f32 from vector<1x1x1xf32>
      %cst_27 = arith.constant 0.000000e+00 : f32
      %38 = arith.addf %cst_27, %37 : f32
      %39 = arith.addf %10, %20 : vector<32x32xf32>
      %40 = arith.addf %11, %17 : vector<32x32xf32>
      %41 = vector.shape_cast %20 : vector<32x32xf32> to vector<1x32x32xf32>
      %cst_28 = arith.constant dense<0.000000e+00> : vector<1xf32>
      %42 = vector.multi_reduction <add>, %41, %cst_28 [1, 2] : vector<1x32x32xf32> to vector<1xf32>
      %43 = vector.shape_cast %42 : vector<1xf32> to vector<1x1x1xf32>
      %44 = vector.extract %43[0, 0, 0] : f32 from vector<1x1x1xf32>
      %cst_29 = arith.constant 1.024000e+03 : f32
      %45 = arith.divf %44, %cst_29 : f32
      %46 = arith.index_cast %arg10 : i32 to index
      %c1 = arith.constant 1 : index
      %c0_30 = arith.constant 0 : index
      %c0_31 = arith.constant 0 : index
      %47 = vector.load %arg6[%46, %c1, %c0_30, %c0_31] : memref<2x3x32x32xf32, #tpu.memory_space<vmem>>, vector<1x1x32x32xf32>
      %48 = vector.shape_cast %47 : vector<1x1x32x32xf32> to vector<32x32xf32>
      %49 = arith.index_cast %arg10 : i32 to index
      %c1_32 = arith.constant 1 : index
      %c0_33 = arith.constant 0 : index
      %c0_34 = arith.constant 0 : index
      %50 = vector.load %arg7[%49, %c1_32, %c0_33, %c0_34] : memref<2x3x32x32xf32, #tpu.memory_space<vmem>>, vector<1x1x32x32xf32>
      %51 = vector.shape_cast %50 : vector<1x1x32x32xf32> to vector<32x32xf32>
      %52 = arith.index_cast %arg10 : i32 to index
      %c1_35 = arith.constant 1 : index
      %c0_36 = arith.constant 0 : index
      %c0_37 = arith.constant 0 : index
      %53 = vector.load %arg8[%52, %c1_35, %c0_36, %c0_37] : memref<2x3x32x32xf32, #tpu.memory_space<vmem>>, vector<1x1x32x32xf32>
      %54 = vector.shape_cast %53 : vector<1x1x32x32xf32> to vector<32x32xf32>
      %55 = vector.extract_strided_slice %48 {offsets = [1, 0], sizes = [31, 32], strides = [1, 1]} : vector<32x32xf32> to vector<31x32xf32>
      %56 = vector.extract_strided_slice %48 {offsets = [0, 0], sizes = [31, 32], strides = [1, 1]} : vector<32x32xf32> to vector<31x32xf32>
      %57 = arith.subf %55, %56 : vector<31x32xf32>
      %58 = vector.extract_strided_slice %48 {offsets = [0, 1], sizes = [32, 31], strides = [1, 1]} : vector<32x32xf32> to vector<32x31xf32>
      %59 = vector.extract_strided_slice %48 {offsets = [0, 0], sizes = [32, 31], strides = [1, 1]} : vector<32x32xf32> to vector<32x31xf32>
      %60 = arith.subf %58, %59 : vector<32x31xf32>
      %61 = arith.mulf %57, %57 : vector<31x32xf32>
      %62 = vector.shape_cast %61 : vector<31x32xf32> to vector<1x31x32xf32>
      %cst_38 = arith.constant dense<0.000000e+00> : vector<1xf32>
      %63 = vector.multi_reduction <add>, %62, %cst_38 [1, 2] : vector<1x31x32xf32> to vector<1xf32>
      %64 = vector.shape_cast %63 : vector<1xf32> to vector<1x1x1xf32>
      %65 = vector.extract %64[0, 0, 0] : f32 from vector<1x1x1xf32>
      %66 = arith.addf %32, %65 : f32
      %67 = arith.mulf %60, %60 : vector<32x31xf32>
      %68 = vector.shape_cast %67 : vector<32x31xf32> to vector<1x32x31xf32>
      %cst_39 = arith.constant dense<0.000000e+00> : vector<1xf32>
      %69 = vector.multi_reduction <add>, %68, %cst_39 [1, 2] : vector<1x32x31xf32> to vector<1xf32>
      %70 = vector.shape_cast %69 : vector<1xf32> to vector<1x1x1xf32>
      %71 = vector.extract %70[0, 0, 0] : f32 from vector<1x1x1xf32>
      %72 = arith.addf %38, %71 : f32
      %73 = arith.addf %39, %54 : vector<32x32xf32>
      %74 = arith.addf %40, %51 : vector<32x32xf32>
      %75 = vector.shape_cast %54 : vector<32x32xf32> to vector<1x32x32xf32>
      %cst_40 = arith.constant dense<0.000000e+00> : vector<1xf32>
      %76 = vector.multi_reduction <add>, %75, %cst_40 [1, 2] : vector<1x32x32xf32> to vector<1xf32>
      %77 = vector.shape_cast %76 : vector<1xf32> to vector<1x1x1xf32>
      %78 = vector.extract %77[0, 0, 0] : f32 from vector<1x1x1xf32>
      %cst_41 = arith.constant 1.024000e+03 : f32
      %79 = arith.divf %78, %cst_41 : f32
      %80 = arith.index_cast %arg10 : i32 to index
      %c2 = arith.constant 2 : index
      %c0_42 = arith.constant 0 : index
      %c0_43 = arith.constant 0 : index
      %81 = vector.load %arg6[%80, %c2, %c0_42, %c0_43] : memref<2x3x32x32xf32, #tpu.memory_space<vmem>>, vector<1x1x32x32xf32>
      %82 = vector.shape_cast %81 : vector<1x1x32x32xf32> to vector<32x32xf32>
      %83 = arith.index_cast %arg10 : i32 to index
      %c2_44 = arith.constant 2 : index
      %c0_45 = arith.constant 0 : index
      %c0_46 = arith.constant 0 : index
      %84 = vector.load %arg7[%83, %c2_44, %c0_45, %c0_46] : memref<2x3x32x32xf32, #tpu.memory_space<vmem>>, vector<1x1x32x32xf32>
      %85 = vector.shape_cast %84 : vector<1x1x32x32xf32> to vector<32x32xf32>
      %86 = arith.index_cast %arg10 : i32 to index
      %c2_47 = arith.constant 2 : index
      %c0_48 = arith.constant 0 : index
      %c0_49 = arith.constant 0 : index
      %87 = vector.load %arg8[%86, %c2_47, %c0_48, %c0_49] : memref<2x3x32x32xf32, #tpu.memory_space<vmem>>, vector<1x1x32x32xf32>
      %88 = vector.shape_cast %87 : vector<1x1x32x32xf32> to vector<32x32xf32>
      %89 = vector.extract_strided_slice %82 {offsets = [1, 0], sizes = [31, 32], strides = [1, 1]} : vector<32x32xf32> to vector<31x32xf32>
      %90 = vector.extract_strided_slice %82 {offsets = [0, 0], sizes = [31, 32], strides = [1, 1]} : vector<32x32xf32> to vector<31x32xf32>
      %91 = arith.subf %89, %90 : vector<31x32xf32>
      %92 = vector.extract_strided_slice %82 {offsets = [0, 1], sizes = [32, 31], strides = [1, 1]} : vector<32x32xf32> to vector<32x31xf32>
      %93 = vector.extract_strided_slice %82 {offsets = [0, 0], sizes = [32, 31], strides = [1, 1]} : vector<32x32xf32> to vector<32x31xf32>
      %94 = arith.subf %92, %93 : vector<32x31xf32>
      %95 = arith.mulf %91, %91 : vector<31x32xf32>
      %96 = vector.shape_cast %95 : vector<31x32xf32> to vector<1x31x32xf32>
      %cst_50 = arith.constant dense<0.000000e+00> : vector<1xf32>
      %97 = vector.multi_reduction <add>, %96, %cst_50 [1, 2] : vector<1x31x32xf32> to vector<1xf32>
      %98 = vector.shape_cast %97 : vector<1xf32> to vector<1x1x1xf32>
      %99 = vector.extract %98[0, 0, 0] : f32 from vector<1x1x1xf32>
      %100 = arith.addf %66, %99 : f32
      %101 = arith.mulf %94, %94 : vector<32x31xf32>
      %102 = vector.shape_cast %101 : vector<32x31xf32> to vector<1x32x31xf32>
      %cst_51 = arith.constant dense<0.000000e+00> : vector<1xf32>
      %103 = vector.multi_reduction <add>, %102, %cst_51 [1, 2] : vector<1x32x31xf32> to vector<1xf32>
      %104 = vector.shape_cast %103 : vector<1xf32> to vector<1x1x1xf32>
      %105 = vector.extract %104[0, 0, 0] : f32 from vector<1x1x1xf32>
      %106 = arith.addf %72, %105 : f32
      %107 = arith.addf %73, %88 : vector<32x32xf32>
      %108 = arith.addf %74, %85 : vector<32x32xf32>
      %109 = vector.shape_cast %88 : vector<32x32xf32> to vector<1x32x32xf32>
      %cst_52 = arith.constant dense<0.000000e+00> : vector<1xf32>
      %110 = vector.multi_reduction <add>, %109, %cst_52 [1, 2] : vector<1x32x32xf32> to vector<1xf32>
      %111 = vector.shape_cast %110 : vector<1xf32> to vector<1x1x1xf32>
      %112 = vector.extract %111[0, 0, 0] : f32 from vector<1x1x1xf32>
      %cst_53 = arith.constant 1.024000e+03 : f32
      %113 = arith.divf %112, %cst_53 : f32
      %cst_54 = arith.constant 9.920000e+02 : f32
      %114 = arith.divf %100, %cst_54 : f32
      %cst_55 = arith.constant 9.920000e+02 : f32
      %115 = arith.divf %106, %cst_55 : f32
      %116 = arith.addf %114, %115 : f32
      %cst_56 = arith.constant 4.000000e+02 : f32
      %117 = arith.mulf %cst_56, %116 : f32
      %cst_57 = arith.constant 0.333333343 : f32
      %118 = vector.broadcast %cst_57 : f32 to vector<32x32xf32>
      %119 = arith.mulf %107, %118 : vector<32x32xf32>
      %120 = arith.subf %107, %108 : vector<32x32xf32>
      %cst_58 = arith.constant 0.333333343 : f32
      %121 = vector.broadcast %cst_58 : f32 to vector<32x32xf32>
      %122 = arith.mulf %120, %121 : vector<32x32xf32>
      %cst_59 = arith.constant dense<0.000000e+00> : vector<32x8xf32>
      %123 = tpu.matmul %119, %1, %cst_59 {dimension_numbers = #tpu.dot_dimension_numbers<[1], [0], [0], [1], [0, 0, 1, 1], [], []>} : vector<32x32xf32>, vector<32x8xf32>, vector<32x8xf32> -> vector<32x8xf32>
      %cst_60 = arith.constant dense<0.000000e+00> : vector<8x8xf32>
      %124 = tpu.matmul %0, %123, %cst_60 {dimension_numbers = #tpu.dot_dimension_numbers<[1], [0], [0], [1], [0, 0, 1, 1], [], []>} : vector<8x32xf32>, vector<32x8xf32>, vector<8x8xf32> -> vector<8x8xf32>
      %cst_61 = arith.constant dense<0.000000e+00> : vector<32x8xf32>
      %125 = tpu.matmul %122, %1, %cst_61 {dimension_numbers = #tpu.dot_dimension_numbers<[1], [0], [0], [1], [0, 0, 1, 1], [], []>} : vector<32x32xf32>, vector<32x8xf32>, vector<32x8xf32> -> vector<32x8xf32>
      %cst_62 = arith.constant dense<0.000000e+00> : vector<8x8xf32>
      %126 = tpu.matmul %0, %125, %cst_62 {dimension_numbers = #tpu.dot_dimension_numbers<[1], [0], [0], [1], [0, 0, 1, 1], [], []>} : vector<8x32xf32>, vector<32x8xf32>, vector<8x8xf32> -> vector<8x8xf32>
      %127 = vector.extract_strided_slice %126 {offsets = [1, 0], sizes = [7, 8], strides = [1, 1]} : vector<8x8xf32> to vector<7x8xf32>
      %128 = vector.extract_strided_slice %126 {offsets = [0, 0], sizes = [7, 8], strides = [1, 1]} : vector<8x8xf32> to vector<7x8xf32>
      %129 = arith.subf %127, %128 : vector<7x8xf32>
      %130 = vector.extract_strided_slice %126 {offsets = [0, 1], sizes = [8, 7], strides = [1, 1]} : vector<8x8xf32> to vector<8x7xf32>
      %131 = vector.extract_strided_slice %126 {offsets = [0, 0], sizes = [8, 7], strides = [1, 1]} : vector<8x8xf32> to vector<8x7xf32>
      %132 = arith.subf %130, %131 : vector<8x7xf32>
      %133 = arith.mulf %129, %129 : vector<7x8xf32>
      %134 = vector.shape_cast %133 : vector<7x8xf32> to vector<1x7x8xf32>
      %cst_63 = arith.constant dense<0.000000e+00> : vector<1xf32>
      %135 = vector.multi_reduction <add>, %134, %cst_63 [1, 2] : vector<1x7x8xf32> to vector<1xf32>
      %136 = vector.shape_cast %135 : vector<1xf32> to vector<1x1x1xf32>
      %137 = vector.extract %136[0, 0, 0] : f32 from vector<1x1x1xf32>
      %138 = arith.mulf %132, %132 : vector<8x7xf32>
      %139 = vector.shape_cast %138 : vector<8x7xf32> to vector<1x8x7xf32>
      %cst_64 = arith.constant dense<0.000000e+00> : vector<1xf32>
      %140 = vector.multi_reduction <add>, %139, %cst_64 [1, 2] : vector<1x8x7xf32> to vector<1xf32>
      %141 = vector.shape_cast %140 : vector<1xf32> to vector<1x1x1xf32>
      %142 = vector.extract %141[0, 0, 0] : f32 from vector<1x1x1xf32>
      %143 = arith.addf %137, %142 : f32
      %cst_65 = arith.constant 2.000000e+00 : f32
      %144 = arith.mulf %cst_65, %143 : f32
      %145 = vector.extract_strided_slice %126 {offsets = [0, 0], sizes = [1, 8], strides = [1, 1]} : vector<8x8xf32> to vector<1x8xf32>
      %146 = arith.mulf %145, %145 : vector<1x8xf32>
      %147 = vector.shape_cast %146 : vector<1x8xf32> to vector<1x1x8xf32>
      %cst_66 = arith.constant dense<0.000000e+00> : vector<1xf32>
      %148 = vector.multi_reduction <add>, %147, %cst_66 [1, 2] : vector<1x1x8xf32> to vector<1xf32>
      %149 = vector.shape_cast %148 : vector<1xf32> to vector<1x1x1xf32>
      %150 = vector.extract %149[0, 0, 0] : f32 from vector<1x1x1xf32>
      %151 = arith.addf %144, %150 : f32
      %152 = vector.extract_strided_slice %126 {offsets = [7, 0], sizes = [1, 8], strides = [1, 1]} : vector<8x8xf32> to vector<1x8xf32>
      %153 = arith.mulf %152, %152 : vector<1x8xf32>
      %154 = vector.shape_cast %153 : vector<1x8xf32> to vector<1x1x8xf32>
      %cst_67 = arith.constant dense<0.000000e+00> : vector<1xf32>
      %155 = vector.multi_reduction <add>, %154, %cst_67 [1, 2] : vector<1x1x8xf32> to vector<1xf32>
      %156 = vector.shape_cast %155 : vector<1xf32> to vector<1x1x1xf32>
      %157 = vector.extract %156[0, 0, 0] : f32 from vector<1x1x1xf32>
      %158 = arith.addf %151, %157 : f32
      %159 = vector.extract_strided_slice %126 {offsets = [0, 0], sizes = [8, 1], strides = [1, 1]} : vector<8x8xf32> to vector<8x1xf32>
      %160 = arith.mulf %159, %159 : vector<8x1xf32>
      %161 = vector.shape_cast %160 : vector<8x1xf32> to vector<1x8x1xf32>
      %cst_68 = arith.constant dense<0.000000e+00> : vector<1xf32>
      %162 = vector.multi_reduction <add>, %161, %cst_68 [1, 2] : vector<1x8x1xf32> to vector<1xf32>
      %163 = vector.shape_cast %162 : vector<1xf32> to vector<1x1x1xf32>
      %164 = vector.extract %163[0, 0, 0] : f32 from vector<1x1x1xf32>
      %165 = arith.addf %158, %164 : f32
      %166 = vector.extract_strided_slice %126 {offsets = [0, 7], sizes = [8, 1], strides = [1, 1]} : vector<8x8xf32> to vector<8x1xf32>
      %167 = arith.mulf %166, %166 : vector<8x1xf32>
      %168 = vector.shape_cast %167 : vector<8x1xf32> to vector<1x8x1xf32>
      %cst_69 = arith.constant dense<0.000000e+00> : vector<1xf32>
      %169 = vector.multi_reduction <add>, %168, %cst_69 [1, 2] : vector<1x8x1xf32> to vector<1xf32>
      %170 = vector.shape_cast %169 : vector<1xf32> to vector<1x1x1xf32>
      %171 = vector.extract %170[0, 0, 0] : f32 from vector<1x1x1xf32>
      %172 = arith.addf %165, %171 : f32
      %cst_70 = arith.constant 6.400000e+01 : f32
      %173 = arith.divf %172, %cst_70 : f32
      %cst_71 = arith.constant dense<0.000000e+00> : vector<8x2xf32>
      %174 = tpu.matmul %124, %3, %cst_71 {dimension_numbers = #tpu.dot_dimension_numbers<[1], [0], [0], [1], [0, 0, 1, 1], [], []>} : vector<8x8xf32>, vector<8x2xf32>, vector<8x2xf32> -> vector<8x2xf32>
      %cst_72 = arith.constant dense<0.000000e+00> : vector<2x2xf32>
      %175 = tpu.matmul %2, %174, %cst_72 {dimension_numbers = #tpu.dot_dimension_numbers<[1], [0], [0], [1], [0, 0, 1, 1], [], []>} : vector<2x8xf32>, vector<8x2xf32>, vector<2x2xf32> -> vector<2x2xf32>
      %cst_73 = arith.constant 6.000000e-01 : f32
      %176 = vector.broadcast %cst_73 : f32 to vector<2x2xf32>
      %177 = arith.subf %175, %176 : vector<2x2xf32>
      %178 = arith.mulf %177, %177 : vector<2x2xf32>
      %179 = vector.shape_cast %178 : vector<2x2xf32> to vector<1x2x2xf32>
      %cst_74 = arith.constant dense<0.000000e+00> : vector<1xf32>
      %180 = vector.multi_reduction <add>, %179, %cst_74 [1, 2] : vector<1x2x2xf32> to vector<1xf32>
      %181 = vector.shape_cast %180 : vector<1xf32> to vector<1x1x1xf32>
      %182 = vector.extract %181[0, 0, 0] : f32 from vector<1x1x1xf32>
      %cst_75 = arith.constant 1.000000e+01 : f32
      %183 = arith.mulf %cst_75, %182 : f32
      %cst_76 = arith.constant 4.000000e+00 : f32
      %184 = arith.divf %183, %cst_76 : f32
      %185 = arith.subf %45, %79 : f32
      %186 = arith.mulf %185, %185 : f32
      %187 = arith.subf %45, %113 : f32
      %188 = arith.mulf %187, %187 : f32
      %189 = arith.subf %113, %79 : f32
      %190 = arith.mulf %189, %189 : f32
      %191 = arith.mulf %186, %186 : f32
      %192 = arith.mulf %188, %188 : f32
      %193 = arith.addf %191, %192 : f32
      %194 = arith.mulf %190, %190 : f32
      %195 = arith.addf %193, %194 : f32
      %196 = math.sqrt %195 : f32
      %cst_77 = arith.constant 5.000000e+00 : f32
      %197 = arith.mulf %cst_77, %196 : f32
      %198 = arith.addf %117, %173 : f32
      %199 = arith.addf %198, %184 : f32
      %200 = arith.addf %199, %197 : f32
      %cst_78 = arith.constant 5.000000e-01 : f32
      %201 = arith.mulf %cst_78, %200 : f32
      %202 = arith.addf %arg11, %201 : f32
      scf.yield %202 : f32
    }
    %c2_i32_7 = arith.constant 2 : i32
    %cst_8 = arith.constant 0.000000e+00 : f32
    %6 = vector.broadcast %cst_8 : f32 to vector<1x1x8x128xf32>
    %7 = vector.broadcast %5 : f32 to vector<1x1x8x128xf32>
    %8 = arith.addf %6, %7 : vector<1x1x8x128xf32>
    %c0_9 = arith.constant 0 : index
    %c0_10 = arith.constant 0 : index
    %c0_11 = arith.constant 0 : index
    %c0_12 = arith.constant 0 : index
    %9 = vector.load %arg9[%c0_9, %c0_10, %c0_11, %c0_12] : memref<1x1x8x128xf32, #tpu.memory_space<vmem>>, vector<1x1x8x128xf32>
    tpu.vector_store %arg9[%c0_9, %c0_10, %c0_11, %c0_12], %8 {strides = array<i32>} : memref<1x1x8x128xf32, #tpu.memory_space<vmem>>, vector<1x1x8x128xf32>,
    return
  }
  func.func @transform_0(%arg0: i32, %arg1: i32) -> (i32, i32) {
    %c0_i32 = arith.constant 0 : i32
    %c0_i32_0 = arith.constant 0 : i32
    %c0_i32_1 = arith.constant 0 : i32
    return %c0_i32, %c0_i32_0 : i32, i32
  }
  func.func @transform_1(%arg0: i32, %arg1: i32) -> (i32, i32) {
    %c0_i32 = arith.constant 0 : i32
    %c0_i32_0 = arith.constant 0 : i32
    %c0_i32_1 = arith.constant 0 : i32
    return %c0_i32, %c0_i32_0 : i32, i32
  }
  func.func @transform_2(%arg0: i32, %arg1: i32) -> (i32, i32) {
    %c0_i32 = arith.constant 0 : i32
    %c0_i32_0 = arith.constant 0 : i32
    %c0_i32_1 = arith.constant 0 : i32
    return %c0_i32, %c0_i32_0 : i32, i32
  }
  func.func @transform_3(%arg0: i32, %arg1: i32) -> (i32, i32) {
    %c0_i32 = arith.constant 0 : i32
    %c0_i32_0 = arith.constant 0 : i32
    %c0_i32_1 = arith.constant 0 : i32
    return %c0_i32, %c0_i32_0 : i32, i32
  }
  func.func @transform_4(%arg0: i32, %arg1: i32) -> (i32, i32, i32, i32) {
    %c1_i32 = arith.constant 1 : i32
    %0 = arith.muli %arg0, %c1_i32 : i32
    %1 = arith.addi %0, %arg1 : i32
    %c0_i32 = arith.constant 0 : i32
    %c0_i32_0 = arith.constant 0 : i32
    %c0_i32_1 = arith.constant 0 : i32
    %c0_i32_2 = arith.constant 0 : i32
    return %1, %c0_i32, %c0_i32_0, %c0_i32_1 : i32, i32, i32, i32
  }
  func.func @transform_5(%arg0: i32, %arg1: i32) -> (i32, i32, i32, i32) {
    %c1_i32 = arith.constant 1 : i32
    %0 = arith.muli %arg0, %c1_i32 : i32
    %1 = arith.addi %0, %arg1 : i32
    %c0_i32 = arith.constant 0 : i32
    %c0_i32_0 = arith.constant 0 : i32
    %c0_i32_1 = arith.constant 0 : i32
    %c0_i32_2 = arith.constant 0 : i32
    return %1, %c0_i32, %c0_i32_0, %c0_i32_1 : i32, i32, i32, i32
  }
  func.func @transform_6(%arg0: i32, %arg1: i32) -> (i32, i32, i32, i32) {
    %c1_i32 = arith.constant 1 : i32
    %0 = arith.muli %arg0, %c1_i32 : i32
    %1 = arith.addi %0, %arg1 : i32
    %c0_i32 = arith.constant 0 : i32
    %c0_i32_0 = arith.constant 0 : i32
    %c0_i32_1 = arith.constant 0 : i32
    %c0_i32_2 = arith.constant 0 : i32
    return %1, %c0_i32, %c0_i32_0, %c0_i32_1 : i32, i32, i32, i32
  }
  func.func @transform_7(%arg0: i32, %arg1: i32) -> (i32, i32, i32, i32) {
    %c0_i32 = arith.constant 0 : i32
    %c0_i32_0 = arith.constant 0 : i32
    %c0_i32_1 = arith.constant 0 : i32
    return %arg0, %arg1, %c0_i32, %c0_i32_0 : i32, i32, i32, i32
  }
}

</mosaic_0001>

<bundles_post_ra>
// kernel: tpu_custom_call.1
= control target key start
LH: loop header
LB: loop body
LE: loop exit
PB: predicated region body
PF: predicated region fallthrough
CT: control target
= control target key end

     0   :  { %s2865_s0 = inlined_call_operand.vmem [shape: f32[8,32], index: 0, kind: input, shape index: {}]   ;;  %s2866_s1 = inlined_call_operand.vmem [shape: f32[32,8], index: 1, kind: input, shape index: {}]   ;;  %s2867_s2 = inlined_call_operand.vmem [shape: f32[2,8], index: 2, kind: input, shape index: {}]   ;;  %s2868_s3 = inlined_call_operand.vmem [shape: f32[8,2], index: 3, kind: input, shape index: {}]   ;;  %s2869_s4 = inlined_call_operand.hbm [shape: f32[4,3,32,32], index: 4, kind: input, shape index: {}]   ;;  %s2870_s5 = inlined_call_operand.hbm [shape: f32[4,3,32,32], index: 5, kind: input, shape index: {}]   ;;  %s2871_s6 = inlined_call_operand.hbm [shape: f32[4,3,32,32], index: 6, kind: input, shape index: {}]   ;;  %s2872_s7 = inlined_call_operand.hbm [shape: f32[2,1,8,128], index: 7, kind: output, shape index: {}]  }
   0x1   :  { %2887 = sst [smem:[#allocation18_spill]] %s2865_s0 }
   0x2   :  { %2888 = sst [smem:[#allocation19_spill]] %s2866_s1 }
   0x3   :  { %2889 = sst [smem:[#allocation20_spill]] %s2867_s2 }
   0x4   :  { %2890 = sst [smem:[#allocation21_spill]] %s2868_s3 }
   0x5   :  { %2891 = sst [smem:[#allocation22_spill]] %s2869_s4 }
   0x6   :  { %2892 = sst [smem:[#allocation23_spill]] %s2870_s5 }
   0x7   :  { %2893 = sst [smem:[#allocation24_spill]] %s2871_s6 }
   0x8   :  { %2894 = sst [smem:[#allocation25_spill]] %s2872_s7 }
   0x9   :  { %12 = vsyncpa [#allocation3], 0 }
   0xa   :  { %14 = vsyncpa [#allocation3 + $0x1], 0 }
   0xb   :  { %15 = vsyncpa [#allocation6], 0 }
   0xc   :  { %17 = vsyncpa [#allocation6 + $0x1], 0 }
   0xd   :  { %18 = vsyncpa [#allocation4], 0 }
   0xe   :  { %20 = vsyncpa [#allocation4 + $0x1], 0  ;;  %s2256_s24 = smov 0   ;;  %s2258_s25 = smov 0  }
   0xf   :  { %s2260_s26 = smov 0   ;;  %s2262_s27 = smov 0  }
  0x10   :  { %s2264_s28 = smov 0   ;;  %s2266_s29 = smov 0  }
  0x11 LB: > { %2895 = sst [smem:[#allocation12_spill]] %s2174_s24  ;;  %s2287_s30 = sadd.s32 4294967295, %s2194_s29   ;;  %s2194_s29 = sphi %s2266_s29, %s26_s29   ;;  %s2190_s28 = sphi %s2264_s28, %s2935_s28   ;;  %s2186_s27 = sphi %s2262_s27, %s2934_s27   ;;  %s2182_s26 = sphi %s2260_s26, %s2938_s26   ;;  %s2178_s25 = sphi %s2258_s25, %s2937_s25   ;;  %s2174_s24 = sphi %s2256_s24, %s2936_s24  }
  0x12   : > { %2896 = sst [smem:[#allocation13_spill]] %s2190_s28  ;;  %s1698_s8 = sadd.s32 4294967294, %s2194_s29  }
  0x13   : > { %2897 = sst [smem:[#allocation14_spill]] %s2194_s29  ;;  %s38_s9 = sadd.s32 1, %s2190_s28 }
  0x14   : > { %s131_s10 = sadd.s32 1, %s2182_s26  ;;  %p40_p0 = scmp.ge.s32.totalorder %s38_s9, 2 }
  0x15   : > { %p138_p1 = scmp.ne.s32.totalorder %s2182_s26, %s2178_s25  ;;  %p139_p2 = scmp.eq.s32.totalorder %s2194_s29, 0 }
  0x16   : > { %p144_p3 = scmp.ne.s32.totalorder %s2178_s25, %s2174_s24  ;;  %s2940_s9 = smov (%p40_p0, %s38_s9), 0 }
  0x17   : > { %2898 = sst [smem:[#allocation15_spill]] %s2940_s9  ;;  %p2299_p4 = por %p139_p2, %p138_p1 }
  0x18   : > { %p145_p5 = scmp.eq.s32.totalorder %s2287_s30, 0  ;;  %s128_s12 = ssub.s32 %s2190_s28, %s2940_s9 }
  0x19   : > { %p226_p6 = scmp.eq.s32.totalorder %s2287_s30, 1  ;;  %p129_p7 = scmp.eq.s32.totalorder %s128_s12, 0 }
  0x1a   : > { %p2307_p8 = por %p145_p5, %p144_p3  ;;  %p232_p10 = scmp.eq.s32.totalorder %s1698_s8, 1 }
  0x1b   : > { %p2311_p9 = por %p226_p6, %p138_p1  ;;  %p1934_p13 = scmp.lt.s32.totalorder %s2194_s29, 2 }
  0x1c   : > { %s2900_s13 = scalar_select %p2307_p8, 1, 0 }
  0x1d   : > { %s2901_s14 = scalar_select %p2311_p9, 1, 0 }
  0x1e   : > { %s2316_s15 = scalar_select %p129_p7, %s2182_s26, %s131_s10  }
  0x1f   : > { %p2318_p11 = por %p232_p10, %p144_p3  ;;  %s2873_s17 = sand.u32 1, %s2182_s26  }
  0x20   : > { %2902 = sst [smem:[#allocation16_spill]] %s2316_s15  ;;  %s2327_s18 = smul.u32 192, %s2873_s17 }
  0x21   : > { %s2903_s16 = scalar_select %p2318_p11, 1, 0 }
  0x22   : > { %s2330_s19 = smul.u32 3072, %s2190_s28  ;;  %p2334_p0 = pnand %p1934_p13, %p2299_p4 }
  0x23   : > { %2904 = sst [smem:[#allocation17_spill]] %s2903_s16  ;;  %s287_s21 = sand.u32 1, %s2194_s29  }
  0x24   : > { %s2906_s5 = sld [smem:[#allocation23_spill]]  ;;  %s291_s10 = scalar_lea.vmem [#allocation5], %s2327_s18 }
  0x25   : > { %s300_s12 = sshll.u32 %s291_s10, 4  ;;  %s2350_s11 = scalar_lea.sflag [#allocation6], %s287_s21  ;;  %s2347_s12 = int_to_ptr.vmem [resolvable:$true] %s300_s12 }
  0x26   : > { %p2356_p4 = pneg %p2334_p0 }
  0x2a   : > { %s2343_s8 = scalar_lea.hbm %s2906_s5, %s2330_s19  ;;  %s2015_s10 = scalar_lea.hbm %s2906_s5, 6144 }
  0x2b   : > { %s2010_s17 = scalar_lea.hbm %s2343_s8, 3072  ;;  %p2016_p7 = scmp.lt.u32.totalorder %s2343_s8, %s2906_s5 }
  0x2c   : > { %p2011_p3 = scmp.ne.s32.totalorder %s2343_s8, %s2010_s17  ;;  %p2017_p10 = scmp.lt.u32.totalorder %s2015_s10, %s2010_s17 }
  0x2d   : > { %p2019_p12 = scmp.lt.u32.totalorder %s2010_s17, %s2343_s8 }
  0x2e   : > { %p2013_p5 = pnand %p2356_p4, %p2011_p3  ;;  %p2018_p13 = por %p2017_p10, %p2016_p7 }
  0x30   : > { %p2014_p6 = pneg %p2013_p5  ;;  %p2020_p1 = por %p2019_p12, %p2018_p13 }
  0x32   : > { %p2021_p2 = pnand %p2020_p1, %p2014_p6 }
  0x34   : > { %2024 = shalt.err (!%p2021_p2)
}
  0x35   : > { %s2025_s21 = scalar_lea.vmem %s2347_s12, 3072  ;;  %s2204_s22 = smov [#allocation5]  }
  0x36   : > { %p2026_p3 = scmp.ne.s32.totalorder %s2347_s12, %s2025_s21  ;;  %s2030_s23 = sshll.u32 %s2204_s22, 4  ;;  %s2031_s23 = int_to_ptr.vmem [resolvable:$false] %s2030_s23 }
  0x37   : > { %s2032_s28 = scalar_lea.vmem %s2031_s23, 6144  ;;  %p2033_p9 = scmp.lt.s32.totalorder %s2347_s12, %s2031_s23 }
  0x38   : > { %p2028_p5 = pnand %p2026_p3, %p2356_p4  ;;  %p2034_p8 = scmp.lt.s32.totalorder %s2032_s28, %s2025_s21 }
  0x3a   : > { %p2029_p11 = pneg %p2028_p5  ;;  %p2035_p7 = por %p2034_p8, %p2033_p9 }
  0x3c   : > { %p2036_p10 = pnand %p2035_p7, %p2029_p11 }
  0x3e   : > { %2039 = shalt.err (!%p2036_p10)
}
  0x3f   : > { %s2878_s15 = smov 128   ;;  %s2880_s17 = smov 8  }
  0x40   : > { %1926 = dma.hbm_to_vmem [thread:$0]  (!%p2334_p0), %s2343_s8, 3072, %s2347_s12, %s2350_s11, %s2878_s15, %s2878_s15, %s2880_s17  }
  0x41   : > { %p2908_p8 = scmp.lt.s32.totalorder %s2194_s29, 3  ;;  %p2909_p9 = scmp.ge.s32.totalorder %s2194_s29, 1 }
  0x42   : > { %s2911_s4 = sld [smem:[#allocation22_spill]]  ;;  %s268_s28 = scalar_lea.vmem [#allocation2], %s2327_s18 }
  0x43   : > { %p2387_p11 = pnand %p2909_p9, %p2908_p8  ;;  %s277_s5 = sshll.u32 %s268_s28, 4  ;;  %s2398_s5 = int_to_ptr.vmem [resolvable:$true] %s277_s5 }
  0x44   : > { %s2912_s6 = sld [smem:[#allocation24_spill]]  ;;  %s2913_s17 = sand.u32 1, %s2182_s26  }
  0x45   : > { %s2910_s10 = scalar_select %p2387_p11, 1, 0 }
  0x46   : > { %s2408_s29 = scalar_lea.sflag [#allocation3], %s2913_s17 }
  0x48   : > { %s2395_s23 = scalar_lea.hbm %s2911_s4, %s2330_s19  ;;  %s2045_s24 = scalar_lea.hbm %s2911_s4, 6144 }
  0x49   : > { %s2040_s16 = scalar_lea.hbm %s2395_s23, 3072  ;;  %p2046_p6 = scmp.lt.u32.totalorder %s2395_s23, %s2911_s4 }
  0x4a   : > { %s2404_s15 = scalar_lea.hbm %s2912_s6, %s2330_s19  ;;  %p2041_p12 = scmp.ne.s32.totalorder %s2395_s23, %s2040_s16 }
  0x4b   : > { %p2047_p13 = scmp.lt.u32.totalorder %s2045_s24, %s2040_s16  ;;  %p2049_p5 = scmp.lt.u32.totalorder %s2040_s16, %s2395_s23 }
  0x4c   : > { %p2043_p1 = pnand %p2041_p12, %p2356_p4 }
  0x4d   : > { %p2048_p3 = por %p2047_p13, %p2046_p6 }
  0x4e   : > { %p2044_p2 = pneg %p2043_p1 }
  0x4f   : > { %p2050_p7 = por %p2049_p5, %p2048_p3 }
  0x51   : > { %p2051_p10 = pnand %p2050_p7, %p2044_p2 }
  0x53   : > { %2054 = shalt.err (!%p2051_p10)
}
  0x54   : > { %s2055_s19 = scalar_lea.vmem %s2398_s5, 3072  ;;  %s2207_s17 = smov [#allocation2]  }
  0x55   : > { %p2056_p8 = scmp.ne.s32.totalorder %s2398_s5, %s2055_s19  ;;  %s2060_s8 = sshll.u32 %s2207_s17, 4  ;;  %s2061_s8 = int_to_ptr.vmem [resolvable:$false] %s2060_s8 }
  0x56   : > { %s2062_s7 = scalar_lea.vmem %s2061_s8, 6144  ;;  %p2063_p1 = scmp.lt.s32.totalorder %s2398_s5, %s2061_s8 }
  0x57   : > { %p2058_p9 = pnand %p2056_p8, %p2356_p4  ;;  %p2064_p11 = scmp.lt.s32.totalorder %s2062_s7, %s2055_s19 }
  0x59   : > { %p2059_p12 = pneg %p2058_p9  ;;  %p2065_p6 = por %p2064_p11, %p2063_p1 }
  0x5b   : > { %p2066_p13 = pnand %p2065_p6, %p2059_p12 }
  0x5d   : > { %2069 = shalt.err (!%p2066_p13)
}
  0x5e   : > { %s2914_s24 = smov 8   ;;  %s2915_s16 = smov 128  }
  0x5f   : > { %1923 = dma.hbm_to_vmem [thread:$0]  (!%p2334_p0), %s2395_s23, 3072, %s2398_s5, %s2408_s29, %s2915_s16, %s2915_s16, %s2914_s24  }
  0x60   : > { %s314_s12 = scalar_lea.vmem [#allocation7], %s2327_s18  ;;  %s2070_s22 = scalar_lea.hbm %s2404_s15, 3072 }
  0x61   : > { %s323_s21 = sshll.u32 %s314_s12, 4  ;;  %p2071_p11 = scmp.ne.s32.totalorder %s2404_s15, %s2070_s22  ;;  %s2436_s21 = int_to_ptr.vmem [resolvable:$true] %s323_s21 }
  0x62   : > { %s2075_s17 = scalar_lea.hbm %s2912_s6, 6144  ;;  %p2076_p5 = scmp.lt.u32.totalorder %s2404_s15, %s2912_s6 }
  0x63   : > { %p2073_p2 = pnand %p2071_p11, %p2356_p4  ;;  %p2077_p7 = scmp.lt.u32.totalorder %s2075_s17, %s2070_s22 }
  0x64   : > { %p2079_p8 = scmp.lt.u32.totalorder %s2070_s22, %s2404_s15 }
  0x65   : > { %p2074_p3 = pneg %p2073_p2  ;;  %p2078_p10 = por %p2077_p7, %p2076_p5 }
  0x67   : > { %p2080_p9 = por %p2079_p8, %p2078_p10 }
  0x69   : > { %p2081_p12 = pnand %p2080_p9, %p2074_p3 }
  0x6b   : > { %2084 = shalt.err (!%p2081_p12)
}
  0x6c   : > { %s2085_s5 = scalar_lea.vmem %s2436_s21, 3072  ;;  %s2208_s29 = smov [#allocation7]  }
  0x6d   : > { %p2086_p1 = scmp.ne.s32.totalorder %s2436_s21, %s2085_s5  ;;  %s2090_s18 = sshll.u32 %s2208_s29, 4  ;;  %s2091_s18 = int_to_ptr.vmem [resolvable:$false] %s2090_s18 }
  0x6e   : > { %s2092_s23 = scalar_lea.vmem %s2091_s18, 6144  ;;  %p2093_p11 = scmp.lt.s32.totalorder %s2436_s21, %s2091_s18 }
  0x6f   : > { %p2088_p6 = pnand %p2086_p1, %p2356_p4  ;;  %p2094_p2 = scmp.lt.s32.totalorder %s2092_s23, %s2085_s5 }
  0x71   : > { %p2089_p13 = pneg %p2088_p6  ;;  %p2095_p5 = por %p2094_p2, %p2093_p11 }
  0x73   : > { %p2096_p7 = pnand %p2095_p5, %p2089_p13 }
  0x75   : > { %2099 = shalt.err (!%p2096_p7)
}
  0x76   : > { %1929 = dma.hbm_to_vmem [thread:$0]  (!%p2334_p0), %s2404_s15, 3072, %s2436_s21, %s2350_s11, %s2915_s16, %s2915_s16, %s2914_s24  }
  0x77   : > { %p2916_p4 = scmp.ne.s32.totalorder %s2910_s10, 0 }
  0x78   : > { %s2466_s9 = sand.u32 (!%p2916_p4), 1, %s2178_s25   ;;  %p2917_p3 = scmp.ne.s32.totalorder (!%p2916_p4), %s2900_s13, 0 }
  0x79   : > { %335 = sbr.rel (%p2916_p4) target bundleno = 1258 (0x4ea), region = 48  ;;  %s338_s20 = scalar_lea.sflag (!%p2916_p4), [#allocation3], %s2466_s9 }
  0x7a   : > { %s2469_s12 = smul.u32 (!%p2916_p4), 192, %s2466_s9 }
  0x80   : > { %2161 = dma.done.wait (%p2917_p3), %s338_s20, 3072  }
  0x81   : > { %2163 = vsyncadd (%p2917_p3), %s338_s20, 4294964224  ;;  %s346_s11 = sand.u32 1, %s2287_s30  }
  0x82   : > { %s347_s15 = scalar_lea.sflag [#allocation6], %s346_s11 }
  0x83   : > { %2165 = dma.done.wait (%p2917_p3), %s347_s15, 6144  }
  0x84   : > { %2167 = vsyncadd (%p2917_p3), %s347_s15, 4294961152  ;;  %s1711_s24 = sshll.u32 %s2466_s9, 3  ;;  %s2918_s0 = sld [smem:[#allocation18_spill]] }
  0x85   : > { %s2919_s1 = sld [smem:[#allocation19_spill]]  ;;  %s2920_s2 = sld [smem:[#allocation20_spill]] }
  0x86   : > { %s2921_s3 = sld [smem:[#allocation21_spill]]  ;;  %s2520_s15 = scalar_lea.vmem [#allocation8], %s1711_s24 }
  0x87   : > { %s2522_s16 = smov 0.0   ;;  %s2524_s21 = smov 0  }
  0x8a   : > { %v2487_v0 = vld [vmem:[%s2918_s0] sm:$0xff] }
  0x8b   : > { %v2492_v1 = vld [vmem:[%s2919_s1] sm:$0xff]  ;;  %v2497_v2 = vld [vmem:[%s2919_s1 + $0x8] sm:$0xff]  ;;  %v2502_v3 = vld [vmem:[%s2919_s1 + $0x10] sm:$0xff] }
  0x8c   : > { %v2507_v4 = vld [vmem:[%s2919_s1 + $0x18] sm:$0xff]  ;;  %v2512_v5 = vld [vmem:[%s2920_s2] sm:$0x3] }
  0x8d   : > { %v2517_v6 = vld [vmem:[%s2921_s3] sm:$0xff] }
  0x8e LB: >> { %v1843_v7 = vpack.c.bf16 %v2497_v2, %v2492_v1  ;;  %v2536_v8 = vpack.c.bf16 %v2507_v4, %v2502_v3  ;;  %s2539_s24 = smul.u32 96, %s2202_s21  ;;  %s2922_s10 = scalar_lea.vmem [#allocation5], %s2469_s12  ;;  %vm492_vm0 = vcmask 261120   ;;  %v2209_v61 = vmov 0.0|0.0   ;;  %s2202_s21 = sphi %s2524_s21, %s418_s21   ;;  %s2198_s16 = sphi %s2522_s16, %s2925_s16  }
  0x8f   : >> { %s2923_s11 = scalar_lea.vmem [#allocation7], %s2469_s12  ;;  %1851 = vmatprep.subr.bf16.mxu1 %v2209_v61  ;;  %vm2210_vm1 = vmmov 0   ;;  %v2211_v62 = vmov 0.0   ;;  %s2924_s22 = scalar_lea.vmem [#allocation2], %s2469_s12  ;;  %vm440_vm2 = vcmask 1040384   ;;  %vm480_vm3 = vcmask 1046528  }
  0x90   : >> { %1844 = vmatprep.subr.bf16.mxu0 %v1843_v7  ;;  %s2545_s28 = scalar_lea.vmem %s2922_s10, %s2539_s24 [#allocation5]  ;;  %s431_s19 = scalar_lea.vmem %s2923_s11, %s2539_s24 [#allocation7]  ;;  %1805 = vmatprep.mubr.msk.f32.mxu1 %vm2210_vm1, %v2211_v62  ;;  %vm498_vm4 = vcmask 260096   ;;  %vm531_vm5 = vcmask 252928   ;;  %vm1332_vm6 = vcmask 64512   ;;  %vm1277_vm7 = vcmask 57344  }
  0x91   : >> { %1846 = vmatpush3.bf16.msra.mxu0 %v1843_v7  ;;  %v427_v9 = vld [vmem:[%s2545_s28] sm:$0xff]  ;;  %v428_v17 = vld [vmem:[%s2545_s28 + $0x8] sm:$0xff]  ;;  %v2574_v27 = vld [vmem:[%s431_s19 + $0x10] sm:$0xff]  ;;  %s421_s30 = scalar_lea.vmem %s2924_s22, %s2539_s24 [#allocation2]  ;;  %s2212_s17 = smov 1   ;;  %vm1247_vm8 = vcmask 63488   ;;  %vm1303_vm9 = vcmask 7168  }
  0x92   : >> { %1848 = vmatprep.subr.bf16.mxu0 %v2536_v8  ;;  %v2551_v10 = vld [vmem:[%s431_s19] sm:$0xff]  ;;  %v2563_v18 = vld [vmem:[%s431_s19 + $0x8] sm:$0xff]  ;;  %v2576_v28 = vld [vmem:[%s431_s19 + $0x30] sm:$0xff]  ;;  %s2213_s13 = smov 127   ;;  %s2214_s8 = smov 121   ;;  %vm1263_vm10 = vcmask 56320  }
  0x93   : >> { %v1716_v11 = vld [vmem:[%s2545_s28 + $0x20] sm:$0xff]  ;;  %v1717_v19 = vld [vmem:[%s2545_s28 + $0x28] sm:$0xff]  ;;  %v2578_v29 = vld [vmem:[%s431_s19 + $0x50] sm:$0xff]  ;;  %v702_v30 = vadd.f32 %v2576_v28, %v2574_v27  ;;  %vm1481_vm11 = vcmask 9216   ;;  %s418_s21 = sadd.s32 1, %s2202_s21  }
  0x94   : >> { %v2554_v12 = vld [vmem:[%s431_s19 + $0x20] sm:$0xff]  ;;  %v704_v13 = vadd.f32 %v1716_v11, %v427_v9  ;;  %v2566_v21 = vld [vmem:[%s431_s19 + $0x28] sm:$0xff]  ;;  %v705_v22 = vadd.f32 %v1717_v19, %v428_v17  ;;  %v2582_v31 = vld [vmem:[%s431_s19 + $0x18] sm:$0xff]  ;;  %p415_p0 = scmp.ge.s32.totalorder %s418_s21, 2  }
  0x95   : >> { %v1728_v14 = vld [vmem:[%s2545_s28 + $0x40] sm:$0xff]  ;;  %1850 = vmatpush3.bf16.msra.mxu0 %v2536_v8  ;;  %v700_v16 = vadd.f32 %v2554_v12, %v2551_v10  ;;  %v1729_v23 = vld [vmem:[%s2545_s28 + $0x48] sm:$0xff]  ;;  %v701_v26 = vadd.f32 %v2566_v21, %v2563_v18  ;;  %v2584_v32 = vld [vmem:[%s431_s19 + $0x38] sm:$0xff]  ;;  %v853_v42 = vadd.f32 %v2578_v29, %v702_v30  ;;  %p2927_p8 = scmp.ne.s32.totalorder (%p415_p0), %s2901_s14, 0  ;;  %s2215_s12 = smov (%p415_p0), [#allocation8]  }
  0x96   : >> { %v2557_v15 = vld [vmem:[%s431_s19 + $0x40] sm:$0xff]  ;;  %v855_v20 = vadd.f32 %v1728_v14, %v704_v13  ;;  %v2569_v24 = vld [vmem:[%s431_s19 + $0x48] sm:$0xff]  ;;  %1858 = vmatprep.subr.bf16.mxu0 %v1843_v7  ;;  %v2586_v33 = vld [vmem:[%s431_s19 + $0x58] sm:$0xff]  ;;  %v856_v36 = vadd.f32 %v1729_v23, %v705_v22  ;;  %v703_v37 = vadd.f32 %v2584_v32, %v2582_v31 }
  0x97   : >> { %v851_v25 = vadd.f32 %v2557_v15, %v700_v16  ;;  %v852_v35 = vadd.f32 %v2569_v24, %v701_v26  ;;  %v429_v38 = vld [vmem:[%s2545_s28 + $0x10] sm:$0xff]  ;;  %v430_v44 = vld [vmem:[%s2545_s28 + $0x18] sm:$0xff]  ;;  %v888_v49 = vmul.f32 0.33333334, %v853_v42  ;;  %v2617_v63 = vld [vmem:[%s421_s30] sm:$0xff] }
  0x98   : >> { %v1718_v39 = vld [vmem:[%s2545_s28 + $0x30] sm:$0xff]  ;;  %v1719_v45 = vld [vmem:[%s2545_s28 + $0x38] sm:$0xff]  ;;  %v854_v47 = vadd.f32 %v2586_v33, %v703_v37  ;;  %456 = vrot.lane.b32.xlu0 %v2617_v63, %s2212_s17  ;;  %v2627_v9 = vld [vmem:[%s421_s30 + $0x28] sm:$0xff] }
  0x99   : >> { %v886_v34 = vmul.f32 0.33333334, %v851_v25  ;;  %v1730_v40 = vld [vmem:[%s2545_s28 + $0x50] sm:$0xff]  ;;  %v890_v41 = vsub.f32 %v851_v25, %v855_v20  ;;  %v706_v43 = vadd.f32 %v1718_v39, %v429_v38  ;;  %v887_v46 = vmul.f32 0.33333334, %v852_v35  ;;  %v1731_v48 = vld [vmem:[%s2545_s28 + $0x58] sm:$0xff] }
  0x9a   : >> { %v707_v51 = vadd.f32 %v1719_v45, %v430_v44  ;;  %v891_v52 = vsub.f32 %v852_v35, %v856_v36  ;;  %v889_v53 = vmul.f32 0.33333334, %v854_v47  ;;  %v2633_v11 = vld [vmem:[%s421_s30 + $0x48] sm:$0xff]  ;;  %v2635_v13 = vld [vmem:[%s421_s30 + $0x40] sm:$0xff]  ;;  %v2641_v14 = vld [vmem:[%s421_s30 + $0x30] sm:$0xff] }
  0x9b   : >> { %1791 = vmatprep.mubr.msk.f32.mxu0 %vm492_vm0, %v886_v34  ;;  %v857_v50 = vadd.f32 %v1730_v40, %v706_v43  ;;  %v894_v54 = vmul.f32 0.33333334, %v890_v41  ;;  %v2643_v16 = vld [vmem:[%s421_s30 + $0x10] sm:$0xff]  ;;  %v2649_v17 = vld [vmem:[%s421_s30 + $0x18] sm:$0xff] }
  0x9c   : >> { %1792 = vmatmul.mubr.msk.f32.vlgmr.msra.gmra.mrb[0].mxu0 %vm492_vm0, %v887_v46  ;;  %v858_v56 = vadd.f32 %v1731_v48, %v707_v51  ;;  %v895_v57 = vmul.f32 0.33333334, %v891_v52  ;;  %v2651_v19 = vld [vmem:[%s421_s30 + $0x50] sm:$0xff]  ;;  %v2657_v20 = vld [vmem:[%s421_s30 + $0x58] sm:$0xff] }
  0x9d   : >> { %1860 = vmatpush3.bf16.msra.mxu0 %v1843_v7  ;;  %1794 = vmatprep.mubr.msk.f32.mxu0 %vm492_vm0, %v888_v49  ;;  %v892_v55 = vsub.f32 %v853_v42, %v857_v50  ;;  %v2619_v7 = vld [vmem:[%s421_s30 + $0x20] sm:$0xff]  ;;  %v2659_v22 = vld [vmem:[%s421_s30 + $0x38] sm:$0xff] }
  0x9e   : >> { %1862 = vmatprep.subr.bf16.mxu0 %v2536_v8  ;;  %v893_v58 = vsub.f32 %v854_v47, %v858_v56  ;;  %611 = vrot.lane.b32.xlu1 %v2619_v7, %s2212_s17 }
  0x9f   : >> { %v896_v59 = vmul.f32 0.33333334, %v892_v55 }
  0xa0   : >> { %1795 = vmatmul.mubr.msk.f32.gmra.mrb[2].mxu0 %vm492_vm0, %v889_v53  ;;  %v897_v60 = vmul.f32 0.33333334, %v893_v58 }
  0xa1   : >> { %1864 = vmatpush3.bf16.msra.mxu0 %v2536_v8  ;;  %1816 = vmatprep.mubr.msk.f32.mxu0 %vm492_vm0, %v894_v54  ;;  %v2625_v8 = vld [vmem:[%s421_s30 + $0x8] sm:$0xff] }
  0xa2   : >> { %1838 = vmatprep.subr.mxu0 %v2211_v62  ;;  %458 = vrot.lane.b32.xlu0 %v2625_v8, %s2212_s17 }
  0xa3   : >> { %613 = vrot.lane.b32.xlu1 %v2627_v9, %s2212_s17 }
  0xa4   : >> { %1817 = vmatmul.mubr.msk.f32.vlgmr.msra.gmra.mrb[4].mxu0 %vm492_vm0, %v895_v57 }
  0xa5   : >> { %1819 = vmatprep.mubr.msk.f32.mxu0 %vm492_vm0, %v896_v59 }
  0xa6   : >> { %762 = vrot.lane.b32.xlu0 %v2635_v13, %s2212_s17 }
  0xa7   : >> { %764 = vrot.lane.b32.xlu1 %v2633_v11, %s2212_s17 }
  0xa8   : >> { %1820 = vmatmul.mubr.msk.f32.gmra.mrb[6].mxu0 %vm492_vm0, %v897_v60 }
  0xa9   : >> { %1840 = vmatprep.mubr.msk.f32.mxu0 %vm2210_vm1, %v2211_v62 }
  0xaa   : >> { %460 = vrot.lane.b32.xlu0 %v2643_v16, %s2212_s17 }
  0xab   : >> { %615 = vrot.lane.b32.xlu1 %v2641_v14, %s2212_s17 }
  0xae   : >> { %766 = vrot.lane.b32.xlu0 %v2651_v19, %s2212_s17 }
  0xaf   : >> { %462 = vrot.lane.b32.xlu1 %v2649_v17, %s2212_s17 }
  0xb2   : >> { %617 = vrot.lane.b32.xlu0 %v2659_v22, %s2212_s17 }
  0xb3   : >> { %768 = vrot.lane.b32.xlu1 %v2657_v20, %s2212_s17 }
 0x10a   : >> { %v457_v36 = vpop.permute.xlu0 %456 }
 0x10b   : >> { %v468_v39 = vsub.f32 %v2617_v63, %v457_v36 }
 0x10d   : >> { %v511_v43 = vmul.f32 %v468_v39, %v468_v39 }
 0x10f   : >> { %519 = vrot.lane.b32.xlu0 %v511_v43, %s2213_s13 }
 0x110   : >> { %v612_v37 = vpop.permute.xlu1 %611 }
 0x111   : >> { %v623_v41 = vsub.f32 %v2619_v7, %v612_v37 }
 0x113   : >> { %v663_v50 = vmul.f32 %v623_v41, %v623_v41 }
 0x114   : >> { %v459_v44 = vpop.permute.xlu0 %458 }
 0x115   : >> { %v614_v45 = vpop.permute.xlu1 %613  ;;  %v469_v47 = vsub.f32 %v2625_v8, %v459_v44  ;;  %671 = vrot.lane.b32.xlu0 %v663_v50, %s2213_s13  ;;  %v599_v50 = vrot.slane %v2641_v14, 7 }
 0x116   : >> { %v624_v48 = vsub.f32 %v2627_v9, %v614_v45  ;;  %v441_v45 = vrot.slane %v2617_v63, 7 }
 0x117   : >> { %v512_v52 = vmul.f32 %v469_v47, %v469_v47  ;;  %v444_v47 = vrot.slane %v2643_v16, 7 }
 0x118   : >> { %v763_v54 = vpop.permute.xlu0 %762  ;;  %v664_v55 = vmul.f32 %v624_v48, %v624_v48  ;;  %v596_v48 = vrot.slane %v2619_v7, 7 }
 0x119   : >> { %v765_v53 = vpop.permute.xlu1 %764  ;;  %521 = vrot.lane.b32.xlu1 %v512_v52, %s2213_s13  ;;  %v774_v57 = vsub.f32 %v2635_v13, %v763_v54 }
 0x11a   : >> { %v775_v56 = vsub.f32 %v2633_v11, %v765_v53 }
 0x11b   : >> { %v814_v58 = vmul.f32 %v774_v57, %v774_v57 }
 0x11c   : >> { %v461_v60 = vpop.permute.xlu0 %460 }
 0x11d   : >> { %v616_v59 = vpop.permute.xlu1 %615  ;;  %673 = vrot.lane.b32.xlu1 %v664_v55, %s2213_s13  ;;  %822 = vrot.lane.b32.xlu0 %v814_v58, %s2213_s13  ;;  %v452_v55 = vsub.f32 %v2617_v63, %v441_v45  ;;  %v607_v58 = vsub.f32 %v2619_v7, %v596_v48 }
 0x16f   : >> { %v1793_v23 = vpop.f32.mrb[0].mxu0 }
 0x170   : >> { %v976_v25 = vpop.f32.mrb[1].mxu0 }
 0x171   : >> { %v1852_v26 = vpack.c.bf16 %v1793_v23, %v976_v25  ;;  %v625_v23 = vsub.f32 %v2641_v14, %v616_v59  ;;  %v470_v25 = vsub.f32 %v2643_v16, %v461_v60 }
 0x173   : >> { %v1796_v30 = vpop.f32.mrb[2].mxu0  ;;  %1853 = vmatpush3.bf16.msra.mxu1 %v1852_v26  ;;  %v513_v26 = vmul.f32 %v470_v25, %v470_v25 }
 0x174   : >> { %v986_v34 = vpop.f32.mrb[3].mxu0  ;;  %1854 = vmatprep.subr.bf16.mxu1 %v2209_v61 }
 0x175   : >> { %v1855_v35 = vpack.c.bf16 %v1796_v30, %v986_v34  ;;  %v463_v30 = vpop.permute.xlu1 %462  ;;  %v767_v34 = vpop.permute.xlu0 %766  ;;  %523 = vrot.lane.b32.xlu0 %v513_v26, %s2213_s13  ;;  %v627_v26 = vmul.f32 %v607_v58, %v607_v58 }
 0x176   : >> { %v471_v36 = vsub.f32 %v2649_v17, %v463_v30  ;;  %v776_v37 = vsub.f32 %v2651_v19, %v767_v34 }
 0x177   : >> { %1856 = vmatpush3.bf16.msra.mxu1 %v1855_v35  ;;  %v1818_v38 = vpop.f32.mrb[4].mxu0  ;;  %v665_v35 = vmul.f32 %v625_v23, %v625_v23 }
 0x178   : >> { %v1146_v40 = vpop.f32.mrb[5].mxu0  ;;  %1865 = vmatprep.subr.bf16.mxu1 %v2209_v61  ;;  %v514_v41 = vmul.f32 %v471_v36, %v471_v36 }
 0x179   : >> { %v1866_v42 = vpack.c.bf16 %v1818_v38, %v1146_v40  ;;  %v816_v38 = vmul.f32 %v776_v37, %v776_v37  ;;  %v769_v39 = vpop.permute.xlu1 %768  ;;  %v618_v40 = vpop.permute.xlu0 %617 }
 0x17a   : >> { %1806 = vmatmul.mubr.msk.f32.vlgmr.msra.gmra.mrb[0].mxu1 %vm492_vm0, %v2487_v0 }
 0x17b   : >> { %v1821_v46 = vpop.f32.mrb[6].mxu0  ;;  %1867 = vmatpush3.bf16.msra.mxu1 %v1866_v42  ;;  %1830 = vmatprep.mubr.msk.f32.mxu1 %vm2210_vm1, %v2211_v62  ;;  %v626_v42 = vsub.f32 %v2659_v22, %v618_v40 }
 0x17c   : >> { %v1156_v49 = vpop.f32.mrb[7].mxu0  ;;  %1868 = vmatprep.subr.bf16.mxu1 %v2209_v61  ;;  %v815_v61 = vmul.f32 %v775_v56, %v775_v56  ;;  %826 = vrot.lane.b32.xlu0 %v816_v38, %s2213_s13 }
 0x17d   : >> { %v1869_v51 = vpack.c.bf16 %v1821_v46, %v1156_v49  ;;  %v666_v43 = vmul.f32 %v626_v42, %v626_v42  ;;  %v442_v46 = vrot.slane %v2625_v8, 7  ;;  %v597_v49 = vrot.slane %v2627_v9, 7 }
 0x17e   : >> { %824 = vrot.lane.b32.xlu1 %v815_v61, %s2213_s13  ;;  %v472_v61 = vmul.f32 %v452_v55, %v452_v55 }
 0x17f   : >> { %1870 = vmatpush3.bf16.msra.mxu1 %v1869_v51  ;;  %v443_v51 = vsel %vm440_vm2, %v441_v45, %v442_v46  ;;  %v445_v52 = vsel %vm440_vm2, %v442_v46, %v444_v47  ;;  %v598_v53 = vsel %vm440_vm2, %v596_v48, %v597_v49  ;;  %v600_v54 = vsel %vm440_vm2, %v597_v49, %v599_v50 }
 0x180   : >> { %1833 = vmatprep.subr.mxu1 %v2211_v62  ;;  %677 = vrot.lane.b32.xlu0 %v666_v43, %s2213_s13  ;;  %v453_v56 = vsub.f32 %v2625_v8, %v443_v51  ;;  %v454_v57 = vsub.f32 %v2643_v16, %v445_v52  ;;  %v608_v59 = vsub.f32 %v2627_v9, %v598_v53  ;;  %v481_v36 = vrot.slane %v472_v61, 1 }
 0x181   : >> { %v609_v60 = vsub.f32 %v2641_v14, %v600_v54  ;;  %v601_v8 = vrot.slane %v2659_v22, 7  ;;  %v635_v16 = vrot.slane %v627_v26, 1  ;;  %v748_v26 = vrot.slane %v2633_v11, 7 }
 0x182   : >> { %1831 = vmatmul.mubr.msk.f32.vlgmr.msra.gmra.mrb[2].mxu1 %vm492_vm0, %v2487_v0  ;;  %675 = vrot.lane.b32.xlu1 %v665_v35, %s2213_s13  ;;  %v473_v23 = vmul.f32 %v453_v56, %v453_v56  ;;  %v474_v25 = vmul.f32 %v454_v57, %v454_v57  ;;  %v628_v30 = vmul.f32 %v608_v59, %v608_v59  ;;  %v446_v35 = vrot.slane %v2649_v17, 7 }
 0x183   : >> { %1834 = vmatpush3.msra.mxu1 %v2517_v6  ;;  %1835 = vmatprep.mubr.msk.f32.mxu1 %vm2210_vm1, %v2211_v62  ;;  %v777_v62 = vsub.f32 %v2657_v20, %v769_v39  ;;  %v629_v34 = vmul.f32 %v609_v60, %v609_v60 }
 0x184   : >> { %v482_v63 = vrot.slane %v473_v23, 1  ;;  %v484_v37 = vrot.slane %v474_v25, 1  ;;  %v636_v38 = vrot.slane %v628_v30, 1  ;;  %v447_v9 = vsel %vm440_vm2, %v444_v47, %v446_v35  ;;  %v520_v23 = vpop.permute.xlu0 %519 }
 0x185   : >> { %v817_v44 = vmul.f32 %v777_v62, %v777_v62  ;;  %v638_v7 = vrot.slane %v629_v34, 1  ;;  %v455_v14 = vsub.f32 %v2649_v17, %v447_v9  ;;  %v532_v25 = vsel %vm531_vm5, %v520_v23, 0.0 }
 0x186   : >> { %525 = vrot.lane.b32.xlu1 %v514_v41, %s2213_s13  ;;  %v483_v39 = vsel %vm480_vm3, %v481_v36, %v482_v63  ;;  %v485_v40 = vsel %vm480_vm3, %v482_v63, %v484_v37  ;;  %v602_v41 = vsel %vm440_vm2, %v599_v50, %v601_v8  ;;  %v750_v30 = vrot.slane %v2651_v19, 7 }
 0x187   : >> { %v493_v62 = vsel %vm492_vm0, %v483_v39, 0.0  ;;  %v494_v42 = vsel %vm492_vm0, %v485_v40, 0.0  ;;  %v610_v43 = vsub.f32 %v2659_v22, %v602_v41  ;;  %v475_v45 = vmul.f32 %v455_v14, %v455_v14 }
 0x188   : >> { %v639_v46 = vsel %vm480_vm3, %v636_v38, %v638_v7  ;;  %v495_v51 = vadd.f32 %v494_v42, %v493_v62  ;;  %v747_v35 = vrot.slane %v2635_v13, 7  ;;  %v672_v63 = vpop.permute.xlu0 %671  ;;  %v709_v9 = vsel %vm492_vm0, %v2566_v21, 0.0 }
 0x189   : >> { %v630_v17 = vmul.f32 %v610_v43, %v610_v43  ;;  %v647_v48 = vsel %vm492_vm0, %v639_v46, 0.0  ;;  %v486_v49 = vrot.slane %v475_v45, 1  ;;  %v683_v8 = vsel %vm531_vm5, %v672_v63, 0.0 }
 0x18a   : >> { %828 = vrot.lane.b32.xlu1 %v817_v44, %s2213_s13  ;;  %v637_v44 = vsel %vm480_vm3, %v635_v16, %v636_v38  ;;  %v751_v16 = vsel %vm440_vm2, %v748_v26, %v750_v30  ;;  %v711_v14 = vsel %vm492_vm0, %v2576_v28, 0.0  ;;  %v758_v39 = vsub.f32 %v2635_v13, %v747_v35 }
 0x18b   : >> { %v646_v47 = vsel %vm492_vm0, %v637_v44, 0.0  ;;  %v640_v50 = vrot.slane %v630_v17, 1  ;;  %v487_v53 = vsel %vm480_vm3, %v484_v37, %v486_v49  ;;  %v499_v22 = vsel %vm498_vm4, %v486_v49, 0.0  ;;  %v522_v34 = vpop.permute.xlu1 %521 }
 0x18c   : >> { %v648_v52 = vadd.f32 %v647_v48, %v646_v47  ;;  %v496_v54 = vsel %vm492_vm0, %v487_v53, 0.0  ;;  %v533_v36 = vsel %vm531_vm5, %v522_v34, 0.0  ;;  %v760_v42 = vsub.f32 %v2651_v19, %v751_v16 }
 0x18d   : >> { %v641_v55 = vsel %vm480_vm3, %v638_v7, %v640_v50  ;;  %v497_v56 = vadd.f32 %v496_v54, %v495_v51  ;;  %v651_v59 = vsel %vm498_vm4, %v640_v50, 0.0  ;;  %v534_v37 = vadd.f32 %v533_v36, %v532_v25 }
 0x18e   : >> { %v649_v57 = vsel %vm492_vm0, %v641_v55, 0.0  ;;  %v708_v7 = vsel %vm492_vm0, %v2554_v12, 0.0  ;;  %v713_v44 = vsel %vm492_vm0, %v2584_v32, 0.0  ;;  %v752_v12 = vrot.slane %v2657_v20, 7 }
 0x18f   : >> { %v650_v58 = vadd.f32 %v649_v57, %v648_v52  ;;  %v500_v60 = vadd.f32 %v499_v22, %v497_v56  ;;  %v674_v38 = vpop.permute.xlu1 %673  ;;  %v823_v41 = vpop.permute.xlu0 %822  ;;  %v710_v62 = vadd.f32 %v709_v9, %v708_v7  ;;  %v749_v21 = vsel %vm440_vm2, %v747_v35, %v748_v26 }
 0x190   : >> { %v684_v40 = vsel %vm531_vm5, %v674_v38, 0.0  ;;  %v778_v47 = vmul.f32 %v758_v39, %v758_v39  ;;  %v780_v13 = vmul.f32 %v760_v42, %v760_v42  ;;  %v834_v49 = vsel %vm531_vm5, %v823_v41, 0.0 }
 0x191   : >> { %v652_v61 = vadd.f32 %v651_v59, %v650_v58  ;;  %v685_v43 = vadd.f32 %v684_v40, %v683_v8  ;;  %v712_v45 = vadd.f32 %v711_v14, %v710_v62  ;;  %v753_v32 = vsel %vm440_vm2, %v750_v30, %v752_v12 }
 0x192   : >> { %v759_v52 = vsub.f32 %v2633_v11, %v749_v21  ;;  %v786_v53 = vrot.slane %v778_v47, 1  ;;  %v761_v56 = vsub.f32 %v2657_v20, %v753_v32  ;;  %v789_v57 = vrot.slane %v780_v13, 1 }
 0x193   : >> { %v714_v17 = vadd.f32 %v713_v44, %v712_v45  ;;  %v558_v21 = vsel %vm492_vm0, %v2563_v18, 0.0  ;;  %v562_v13 = vsel %vm492_vm0, %v2582_v31, 0.0  ;;  %v862_v18 = vsel %vm492_vm0, %v2578_v29, 0.0 }
 0x1ae   : >> { %501 = vadd.xlane.f32.xlu1 %v500_v60  ;;  %v779_v60 = vmul.f32 %v759_v52, %v759_v52 }
 0x1b0   : >> { %v787_v25 = vrot.slane %v779_v60, 1 }
 0x1b2   : >> { %653 = vadd.xlane.f32.xlu1 %v652_v61  ;;  %v781_v61 = vmul.f32 %v761_v56, %v761_v56  ;;  %v788_v63 = vsel %vm480_vm3, %v786_v53, %v787_v25  ;;  %v790_v20 = vsel %vm480_vm3, %v787_v25, %v789_v57 }
 0x1b3   : >> { %v797_v16 = vsel %vm492_vm0, %v788_v63, 0.0  ;;  %v798_v38 = vsel %vm492_vm0, %v790_v20, 0.0 }
 0x1b4   : >> { %v791_v11 = vrot.slane %v781_v61, 1  ;;  %v799_v9 = vadd.f32 %v798_v38, %v797_v16 }
 0x1b6   : >> { %715 = vadd.xlane.f32.xlu1 %v714_v17  ;;  %v792_v8 = vsel %vm480_vm3, %v789_v57, %v791_v11  ;;  %v802_v40 = vsel %vm498_vm4, %v791_v11, 0.0 }
 0x1b7   : >> { %v800_v14 = vsel %vm492_vm0, %v792_v8, 0.0 }
 0x1b8   : >> { %v801_v62 = vadd.f32 %v800_v14, %v799_v9 }
 0x1ba   : >> { %v803_v42 = vadd.f32 %v802_v40, %v801_v62 }
 0x1e7   : >> { %v524_v28 = vpop.permute.xlu0 %523 }
 0x1e8   : >> { %v535_v19 = vsel %vm531_vm5, %v524_v28, 0.0  ;;  %v560_v28 = vsel %vm492_vm0, %v2574_v27, 0.0  ;;  %v864_v27 = vsel %vm492_vm0, %v2586_v33, 0.0 }
 0x1e9   : >> { %v536_v51 = vadd.f32 %v535_v19, %v534_v37  ;;  %v860_v19 = vsel %vm492_vm0, %v2569_v24, 0.0 }
 0x1ee   : >> { %v827_v55 = vpop.permute.xlu0 %826 }
 0x1ef   : >> { %v837_v59 = vsel %vm531_vm5, %v827_v55, 0.0 }
 0x1f0   : >> { %v825_v46 = vpop.permute.xlu1 %824 }
 0x1f1   : >> { %v835_v48 = vsel %vm531_vm5, %v825_v46, 0.0  ;;  %v557_v46 = vsel %vm492_vm0, %v2551_v10, 0.0 }
 0x1f2   : >> { %v836_v54 = vadd.f32 %v835_v48, %v834_v49  ;;  %v678_v34 = vpop.permute.xlu0 %677  ;;  %v559_v47 = vadd.f32 %v558_v21, %v557_v46  ;;  %v859_v49 = vsel %vm492_vm0, %v2557_v15, 0.0 }
 0x1f3   : >> { %v688_v36 = vsel %vm531_vm5, %v678_v34, 0.0  ;;  %v861_v10 = vadd.f32 %v860_v19, %v859_v49 }
 0x1f4   : >> { %v676_v50 = vpop.permute.xlu1 %675  ;;  %v838_v30 = vadd.f32 %v837_v59, %v836_v54  ;;  %v561_v17 = vadd.f32 %v560_v28, %v559_v47 }
 0x1f5   : >> { %v686_v22 = vsel %vm531_vm5, %v676_v50, 0.0 }
 0x1f6   : >> { %v687_v58 = vadd.f32 %v686_v22, %v685_v43  ;;  %v563_v48 = vadd.f32 %v562_v13, %v561_v17 }
 0x1f8   : >> { %v526_v23 = vpop.permute.xlu1 %525  ;;  %v689_v37 = vadd.f32 %v688_v36, %v687_v58 }
 0x1f9   : >> { %v537_v26 = vsel %vm531_vm5, %v526_v23, 0.0 }
 0x1fa   : >> { %v538_v35 = vadd.f32 %v537_v26, %v536_v51  ;;  %v863_v51 = vadd.f32 %v862_v18, %v861_v10 }
 0x1fc   : >> { %v829_v7 = vpop.permute.xlu1 %828  ;;  %v865_v31 = vadd.f32 %v864_v27, %v863_v51 }
 0x1fd   : >> { %v839_v39 = vsel %vm531_vm5, %v829_v7, 0.0 }
 0x1fe   : >> { %v840_v41 = vadd.f32 %v839_v39, %v838_v30 }
 0x200   : >> { %841 = vadd.xlane.f32.xlu1 %v840_v41 }
 0x23b   : >> { %v502_v56 = vpop.xlane.xlu1 %501 }
 0x23c   : >> { %v503_v61 = vrot.slane %v502_v56, 4 }
 0x23e   : >> { %v504_v30 = vadd.f32 %v503_v61, %v502_v56 }
 0x23f   : >> { %v654_v59 = vpop.xlane.xlu1 %653 }
 0x240   : >> { %v655_v23 = vrot.slane %v654_v59, 4  ;;  %v505_v8 = vrot.slane %v504_v30, 2 }
 0x243   : >> { %v716_v60 = vpop.xlane.xlu1 %715 }
 0x244   : >> { %v717_v25 = vrot.slane %v716_v60, 4 }
 0x246   : >> { %v718_v36 = vadd.f32 %v717_v25, %v716_v60 }
 0x248   : >> { %v719_v9 = vrot.slane %v718_v36, 2 }
 0x24d   : >> { %v1064_v43 = vpop.f32.mrb[0].mxu1 }
 0x24e   : >> { %v1807_v44 = vpop.f32.mrb[1].mxu1  ;;  %1836 = vmatmul.mubr.msk.f32.vlgmr.msra.gmra.mrb[4].mxu1 %vm1332_vm6, %v1064_v43 }
 0x255   : >> { %v1231_v45 = vpop.f32.mrb[2].mxu1 }
 0x256   : >> { %1239 = vrot.lane.b32.xlu0 %v1231_v45, %s2212_s17  ;;  %v1832_v12 = vpop.f32.mrb[3].mxu1  ;;  %v1276_v50 = vmul.f32 %v1231_v45, %v1231_v45  ;;  %v1236_v29 = vrot.slane %v1231_v45, 7 }
 0x257   : >> { %v720_v12 = vadd.f32 %v719_v9, %v718_v36 }
 0x258   : >> { %v1290_v32 = vrot.slane %v1276_v50, 7  ;;  %v1238_v54 = vsub.f32 %v1231_v45, %v1236_v29  ;;  %v1278_v57 = vsel %vm1277_vm7, %v1276_v50, 0.0  ;;  %v1304_v58 = vsel %vm1303_vm9, %v1276_v50, 0.0 }
 0x259   : >> { %v721_v51 = vrot.slane %v720_v12, 1 }
 0x25a   : >> { %v2792_v15 = vsel %vm1277_vm7, %v1290_v32, 0.0  ;;  %v1243_v22 = vmul.f32 %v1238_v54, %v1238_v54 }
 0x25c   : >> { %v1245_v33 = vrot.slane %v1243_v22, 1  ;;  %v722_v22 = vadd.f32 %v721_v51, %v720_v12 }
 0x25e   : >> { %v1248_v55 = vsel %vm1247_vm8, %v1245_v33, 0.0 }
 0x275   : >> { %539 = vadd.xlane.f32.xlu0 %v538_v35  ;;  %v656_v35 = vadd.f32 %v655_v23, %v654_v59 }
 0x277   : >> { %v657_v7 = vrot.slane %v656_v35, 2 }
 0x279   : >> { %564 = vadd.xlane.f32.xlu0 %v563_v48 }
 0x27d   : >> { %690 = vadd.xlane.f32.xlu0 %v689_v37 }
 0x281   : >> { %804 = vadd.xlane.f32.xlu0 %v803_v42  ;;  %v506_v42 = vadd.f32 %v505_v8, %v504_v30 }
 0x283   : >> { %v507_v21 = vrot.slane %v506_v42, 1 }
 0x285   : >> { %866 = vadd.xlane.f32.xlu0 %v865_v31  ;;  %v508_v19 = vadd.f32 %v507_v21, %v506_v42 }
 0x287   : >> { %1878 = vpush %v508_v19 }
 0x28d   : >> { %v842_v11 = vpop.xlane.xlu1 %841 }
 0x28e   : >> { %v843_v63 = vrot.slane %v842_v11, 4 }
 0x290   : >> { %v844_v14 = vadd.f32 %v843_v63, %v842_v11 }
 0x292   : >> { %v845_v44 = vrot.slane %v844_v14, 2 }
 0x294   : >> { %v846_v27 = vadd.f32 %v845_v44, %v844_v14 }
 0x296   : >> { %v847_v33 = vrot.slane %v846_v27, 1 }
 0x298   : >> { %v848_v60 = vadd.f32 %v847_v33, %v846_v27 }
 0x29b   : >> { %1315 = vrot.lane.b32.xlu0 %v1276_v50, %s2214_s8 }
 0x2b8   : >> { %s1879_s7 = spop %1878 }
 0x2c8   : >> { %v1240_v24 = vpop.permute.xlu0 %1239 }
 0x2c9   : >> { %v1242_v52 = vsub.f32 %v1231_v45, %v1240_v24  ;;  %v658_v45 = vadd.f32 %v657_v7, %v656_v35 }
 0x2cb   : >> { %v1258_v53 = vmul.f32 %v1242_v52, %v1242_v52  ;;  %v659_v13 = vrot.slane %v658_v45, 1 }
 0x2cd   : >> { %1260 = vrot.lane.b32.xlu1 %v1258_v53, %s2213_s13  ;;  %v660_v50 = vadd.f32 %v659_v13, %v658_v45 }
 0x2f1   : >> { %1249 = vadd.xlane.f32.xlu1 %v1248_v55 }
 0x2f5   : >> { %1279 = vadd.xlane.f32.xlu1 %v1278_v57 }
 0x2f9   : >> { %1305 = vadd.xlane.f32.xlu1 %v1304_v58 }
 0x302   : >> { %v540_v26 = vpop.xlane.xlu0 %539 }
 0x303   : >> { %v541_v34 = vrot.slane %v540_v26, 4 }
 0x305   : >> { %v542_v20 = vadd.f32 %v541_v34, %v540_v26 }
 0x306   : >> { %v565_v37 = vpop.xlane.xlu0 %564 }
 0x307   : >> { %v543_v16 = vrot.slane %v542_v20, 2  ;;  %v566_v38 = vrot.slane %v565_v37, 4 }
 0x309   : >> { %v567_v39 = vadd.f32 %v566_v38, %v565_v37  ;;  %v544_v43 = vadd.f32 %v543_v16, %v542_v20 }
 0x30a   : >> { %v691_v40 = vpop.xlane.xlu0 %690 }
 0x30b   : >> { %v568_v41 = vrot.slane %v567_v39, 2  ;;  %v692_v62 = vrot.slane %v691_v40, 4  ;;  %v545_v47 = vrot.slane %v544_v43, 1 }
 0x30d   : >> { %v693_v46 = vadd.f32 %v692_v62, %v691_v40  ;;  %v569_v28 = vadd.f32 %v568_v41, %v567_v39  ;;  %v546_v10 = vadd.f32 %v545_v47, %v544_v43 }
 0x30e   : >> { %v805_v17 = vpop.xlane.xlu0 %804 }
 0x30f   : >> { %v694_v48 = vrot.slane %v693_v46, 2  ;;  %v806_v49 = vrot.slane %v805_v17, 4  ;;  %v570_v18 = vrot.slane %v569_v28, 1  ;;  %1880 = vpush %v546_v10 }
 0x311   : >> { %v807_v31 = vadd.f32 %v806_v49, %v805_v17  ;;  %v695_v32 = vadd.f32 %v694_v48, %v693_v46  ;;  %v571_v52 = vadd.f32 %v570_v18, %v569_v28 }
 0x312   : >> { %v867_v24 = vpop.xlane.xlu0 %866 }
 0x313   : >> { %v808_v53 = vrot.slane %v807_v31, 2  ;;  %v868_v29 = vrot.slane %v867_v24, 4  ;;  %v696_v54 = vrot.slane %v695_v32, 1  ;;  %1882 = vpush %v571_v52 }
 0x314   : >> { %1884 = vpush %v660_v50 }
 0x315   : >> { %v869_v55 = vadd.f32 %v868_v29, %v867_v24  ;;  %v697_v56 = vadd.f32 %v696_v54, %v695_v32  ;;  %v809_v57 = vadd.f32 %v808_v53, %v807_v31 }
 0x316   : >> { %v1316_v36 = vpop.permute.xlu0 %1315 }
 0x317   : >> { %v870_v58 = vrot.slane %v869_v55, 2  ;;  %1886 = vpush %v697_v56  ;;  %v810_v59 = vrot.slane %v809_v57, 1  ;;  %v1318_v63 = vsel %vm1303_vm9, %v1316_v36, 0.0 }
 0x318   : >> { %1888 = vpush %v722_v22 }
 0x319   : >> { %v811_v61 = vadd.f32 %v810_v59, %v809_v57  ;;  %v871_v23 = vadd.f32 %v870_v58, %v869_v55 }
 0x31b   : >> { %1890 = vpush %v811_v61  ;;  %v872_v25 = vrot.slane %v871_v23, 1 }
 0x31c   : >> { %1892 = vpush %v848_v60 }
 0x31d   : >> { %v873_v26 = vadd.f32 %v872_v25, %v871_v23 }
 0x31f   : >> { %1894 = vpush %v873_v26 }
 0x321   : >> { %v1402_v30 = vpop.f32.mrb[4].mxu1 }
 0x322   : >> { %v1837_v34 = vpop.f32.mrb[5].mxu1  ;;  %1839 = vmatpush3.msra.mxu0 %v1402_v30 }
 0x323   : >> { %1841 = vmatmul.mubr.msk.f32.vlgmr.msra.gmra.mrb[8].mxu0 %vm1332_vm6, %v2512_v5 }
 0x33f   : >> { %v1261_v11 = vpop.permute.xlu1 %1260 }
 0x340   : >> { %v1264_v35 = vsel %vm1263_vm10, %v1261_v11, 0.0  ;;  %s1881_s5 = spop %1880 }
 0x341   : >> { %1265 = vadd.xlane.f32.xlu0 %v1264_v35 }
 0x344   : >> { %s2801_s29 = spop %1882 }
 0x345   : >> { %1293 = vadd.xlane.f32.xlu0 %v2792_v15  ;;  %s1885_s18 = spop %1884 }
 0x346   : >> { %s662_s20 = sadd.f32 %s1885_s18, %s1879_s7 }
 0x348   : >> { %s1887_s23 = spop %1886 }
 0x349   : >> { %1319 = vadd.xlane.f32.xlu0 %v1318_v63  ;;  %s2803_s24 = spop %1888  ;;  %s699_s28 = sadd.f32 %s1887_s23, %s1881_s5 }
 0x34a   : >> { %s726_s7 = smul.f32 0.0009765625, %s2803_s24 }
 0x34c   : >> { %s1891_s19 = spop %1890 }
 0x34d   : >> { %s813_s30 = sadd.f32 %s1891_s19, %s662_s20  ;;  %s1893_s17 = spop %1892 }
 0x34e   : >> { %s850_s13 = sadd.f32 %s1893_s17, %s699_s28 }
 0x34f   : >> { %s880_s8 = smul.f32 0.0010080645, %s813_s30 }
 0x350   : >> { %s883_s10 = smul.f32 0.0010080645, %s850_s13  ;;  %s1895_s5 = spop %1894 }
 0x351   : >> { %s877_s18 = smul.f32 0.0009765625, %s1895_s5 }
 0x352   : >> { %s2805_s11 = sadd.f32 %s883_s10, %s880_s8  ;;  %s575_s10 = smul.f32 0.0009765625, %s2801_s29 }
 0x353   : >> { %s1500_s19 = ssub.f32 %s877_s18, %s726_s7 }
 0x354   : >> { %s1496_s23 = ssub.f32 %s575_s10, %s726_s7 }
 0x355   : >> { %s1498_s20 = ssub.f32 %s575_s10, %s877_s18  ;;  %s1501_s13 = smul.f32 %s1500_s19, %s1500_s19 }
 0x356   : >> { %s1497_s28 = smul.f32 %s1496_s23, %s1496_s23 }
 0x357   : >> { %s1499_s30 = smul.f32 %s1498_s20, %s1498_s20 }
 0x358   : >> { %s1502_s17 = smul.f32 %s1497_s28, %s1497_s28 }
 0x359   : >> { %s1503_s8 = smul.f32 %s1499_s30, %s1499_s30 }
 0x35a   : >> { %s1505_s0 = smul.f32 %s1501_s13, %s1501_s13 }
 0x35b   : >> { %s1504_s22 = sadd.f32 %s1503_s8, %s1502_s17  ;;  %s885_s30 = smul.f32 400.0, %s2805_s11 }
 0x35c   : > { %s1750_s11 = sshll.u32 (%p415_p0), %s2186_s27, 7 }
 0x35d   : >> { %s1506_s1 = sadd.f32 %s1505_s0, %s1504_s22 }
 0x35f   : >> { %v1507_v61 = vstv %s1506_s1 }
 0x360   : >> { %2008 = vrsqrt.f32 %v1507_v61  ;;  %vm1510_vm12 = vcmp.eq.f32.partialorder %v1507_v61, inf  ;;  %v1513_v63 = vand.u32 2147483648, %v1507_v61  ;;  %vm1512_vm13 = vcmp.eq.f32.partialorder %v1507_v61, 0.0 }
 0x36a   : >> { %v2009_v26 = vpop.eup %2008 }
 0x36b   : >> { %v1509_v11 = vmul.f32 %v2009_v26, %v1507_v61 }
 0x37e   : >> { %v1250_v15 = vpop.xlane.xlu1 %1249 }
 0x37f   : >> { %v1251_v20 = vrot.slane %v1250_v15, 4 }
 0x381   : >> { %v1252_v37 = vadd.f32 %v1251_v20, %v1250_v15  ;;  %v1511_v15 = vsel %vm1510_vm12, %v1507_v61, %v1509_v11 }
 0x382   : >> { %v1280_v9 = vpop.xlane.xlu1 %1279 }
 0x383   : >> { %v1253_v8 = vrot.slane %v1252_v37, 2  ;;  %v1281_v14 = vrot.slane %v1280_v9, 4 }
 0x385   : >> { %v1254_v16 = vadd.f32 %v1253_v8, %v1252_v37  ;;  %v1282_v40 = vadd.f32 %v1281_v14, %v1280_v9  ;;  %v1514_v37 = vsel %vm1512_vm13, %v1513_v63, %v1511_v15 }
 0x386   : >> { %v1306_v39 = vpop.xlane.xlu1 %1305 }
 0x387   : >> { %v1255_v38 = vrot.slane %v1254_v16, 1  ;;  %v1307_v41 = vrot.slane %v1306_v39, 4  ;;  %v1283_v62 = vrot.slane %v1282_v40, 2 }
 0x389   : >> { %v1256_v7 = vadd.f32 %v1255_v38, %v1254_v16  ;;  %v1308_v42 = vadd.f32 %v1307_v41, %v1306_v39  ;;  %v1284_v21 = vadd.f32 %v1283_v62, %v1282_v40 }
 0x38b   : >> { %1896 = vpush %v1256_v7  ;;  %v1309_v12 = vrot.slane %v1308_v42, 2  ;;  %v1285_v49 = vrot.slane %v1284_v21, 1 }
 0x38d   : >> { %v1310_v19 = vadd.f32 %v1309_v12, %v1308_v42  ;;  %v1286_v32 = vadd.f32 %v1285_v49, %v1284_v21 }
 0x38f   : >> { %v1311_v24 = vrot.slane %v1310_v19, 1 }
 0x391   : >> { %v1312_v22 = vadd.f32 %v1311_v24, %v1310_v19 }
 0x3bc   : >> { %s1897_s0 = spop %1896 }
 0x3ce   : >> { %v1266_v43 = vpop.xlane.xlu0 %1265 }
 0x3cf   : >> { %v1267_v44 = vrot.slane %v1266_v43, 4 }
 0x3d1   : >> { %v1268_v45 = vadd.f32 %v1267_v44, %v1266_v43 }
 0x3d2   : >> { %v1294_v46 = vpop.xlane.xlu0 %1293 }
 0x3d3   : >> { %v1269_v47 = vrot.slane %v1268_v45, 2  ;;  %v1295_v28 = vrot.slane %v1294_v46, 4 }
 0x3d5   : >> { %v1296_v17 = vadd.f32 %v1295_v28, %v1294_v46  ;;  %v1270_v13 = vadd.f32 %v1269_v47, %v1268_v45 }
 0x3d6   : >> { %v1320_v48 = vpop.xlane.xlu0 %1319 }
 0x3d7   : >> { %v1297_v10 = vrot.slane %v1296_v17, 2  ;;  %v1321_v18 = vrot.slane %v1320_v48, 4  ;;  %v1271_v51 = vrot.slane %v1270_v13, 1 }
 0x3d9   : >> { %v1322_v27 = vadd.f32 %v1321_v18, %v1320_v48  ;;  %v1272_v31 = vadd.f32 %v1271_v51, %v1270_v13  ;;  %v1298_v50 = vadd.f32 %v1297_v10, %v1296_v17 }
 0x3db   : >> { %v1323_v52 = vrot.slane %v1322_v27, 2  ;;  %1898 = vpush %v1272_v31  ;;  %v1299_v53 = vrot.slane %v1298_v50, 1 }
 0x3dc   : >> { %1900 = vpush %v1286_v32 }
 0x3dd   : >> { %v1324_v29 = vadd.f32 %v1323_v52, %v1322_v27  ;;  %v1300_v54 = vadd.f32 %v1299_v53, %v1298_v50 }
 0x3df   : >> { %1902 = vpush %v1300_v54  ;;  %v1325_v33 = vrot.slane %v1324_v29, 1 }
 0x3e0   : >> { %1904 = vpush %v1312_v22 }
 0x3e1   : >> { %v1326_v55 = vadd.f32 %v1325_v33, %v1324_v29 }
 0x3e3   : >> { %1906 = vpush %v1326_v55 }
 0x3f6   : >> { %v1475_v56 = vpop.f32.mrb[8].mxu0 }
 0x3f7   : >> { %v1748_v57 = vadd.f32 -0.6, %v1475_v56  ;;  %v1842_v58 = vpop.f32.mrb[9].mxu0 }
 0x3f9   : >> { %v1480_v59 = vmul.f32 %v1748_v57, %v1748_v57 }
 0x3fb   : >> { %v1482_v60 = vsel %vm1481_vm11, %v1480_v59, 0.0 }
 0x3fc   : >> { %1483 = vadd.xlane.f32.xlu1 %v1482_v60 }
 0x40c   : >> { %s1899_s1 = spop %1898 }
 0x40d   : >> { %s1274_s22 = sadd.f32 %s1899_s1, %s1897_s0  ;;  %s1901_s24 = spop %1900 }
 0x40f   : >> { %s1275_s29 = smul.f32 2.0, %s1274_s22 }
 0x410   : >> { %s1903_s7 = spop %1902 }
 0x411   : >> { %s1288_s10 = sadd.f32 %s1901_s24, %s1275_s29  ;;  %s1905_s18 = spop %1904 }
 0x412   : > { %s1540_s29 = sshll.u32 (%p415_p0), %s2520_s15, 4  ;;  %s1526_s24 = scalar_lea.sflag (%p415_p0), [#allocation4], %s2466_s9  ;;  %s1541_s29 = int_to_ptr.vmem [resolvable:$true] %s1540_s29 }
 0x413   : >> { %s1302_s5 = sadd.f32 %s1903_s7, %s1288_s10  ;;  %s2100_s10 = scalar_lea.vmem (%p415_p0), %s1541_s29, 128 }
 0x414   : >> { %s1907_s20 = spop %1906  ;;  %p2101_p10 = scmp.ne.s32.totalorder (%p415_p0), %s1541_s29, %s2100_s10 }
 0x415   : >> { %s1314_s23 = sadd.f32 %s1905_s18, %s1302_s5 }
 0x416   : > { %p2102_p9 = pnand (%p415_p0), %p2101_p10, %p2927_p8 }
 0x417   : >> { %s1328_s28 = sadd.f32 %s1907_s20, %s1314_s23 }
 0x418   : > { %p2103_p12 = pneg (%p415_p0), %p2102_p9 }
 0x419   : >> { %s1331_s19 = smul.f32 0.015625, %s1328_s28 }
 0x41b   : >> { %s1517_s2 = sadd.f32 %s1331_s19, %s885_s30 }
 0x489   : >> { %v1484_v23 = vpop.xlane.xlu1 %1483 }
 0x48a   : >> { %v1485_v25 = vrot.slane %v1484_v23, 4 }
 0x48c   : >> { %v1486_v30 = vadd.f32 %v1485_v25, %v1484_v23 }
 0x48e   : >> { %v1487_v34 = vrot.slane %v1486_v30, 2 }
 0x490   : >> { %v1488_v35 = vadd.f32 %v1487_v34, %v1486_v30 }
 0x492   : >> { %v1489_v36 = vrot.slane %v1488_v35, 1 }
 0x494   : >> { %v1490_v20 = vadd.f32 %v1489_v36, %v1488_v35 }
 0x496   : >> { %1908 = vpush %v1490_v20 }
 0x497   : >> { %1910 = vpush %v1514_v37 }
 0x4c7   : >> { %s1909_s17 = spop %1908 }
 0x4c8   : >> { %s1492_s13 = smul.f32 10.0, %s1909_s17  ;;  %s1911_s8 = spop %1910 }
 0x4c9   : >> { %s1516_s6 = smul.f32 5.0, %s1911_s8 }
 0x4ca   : >> { %s1495_s3 = smul.f32 0.25, %s1492_s13 }
 0x4cc   : >> { %s1518_s4 = sadd.f32 %s1517_s2, %s1495_s3 }
 0x4ce   : >> { %s1519_s0 = sadd.f32 %s1518_s4, %s1516_s6  ;;  %417 = sbr.rel (!%p415_p0) target bundleno = 142 (0x8e), region = 133 }
 0x4cf   : > { %s2926_s4 = sld [smem:[#allocation25_spill]] (%p415_p0) }
 0x4d0   : >> { %s1520_s1 = smul.f32 0.5, %s1519_s0 }
 0x4d2   : >> { %s1521_s22 = sadd.f32 %s2198_s16, %s1520_s1  }
 0x4d4   : >> { %s2925_s16 = smov %s1521_s22  ;;  %v1522_v8 = vstv (%p415_p0), %s1521_s22 }
 0x4d5   : > { %1524 = vst [vmem:[%s2520_s15] sm:$0xff] %v1522_v8  ;;  %s2821_s6 = scalar_lea.hbm %s2926_s4, %s1750_s11  ;;  %s2104_s16 = sshll.u32 %s2215_s12, 4  ;;  %s2105_s16 = int_to_ptr.vmem [resolvable:$false] %s2104_s16 }
 0x4d6   : > { %s2106_s21 = scalar_lea.vmem %s2105_s16, 256  ;;  %p2107_p1 = scmp.lt.s32.totalorder %s1541_s29, %s2105_s16 }
 0x4d7   : > { %p2108_p6 = scmp.lt.s32.totalorder %s2106_s21, %s2100_s10 }
 0x4d9   : > { %p2109_p13 = por %p2108_p6, %p2107_p1 }
 0x4db   : > { %p2110_p11 = pnand %p2109_p13, %p2103_p12 }
 0x4dd   : > { %2113 = shalt.err (!%p2110_p11)
}
 0x4de   : > { %s2114_s27 = scalar_lea.hbm %s2821_s6, 128  ;;  %s2118_s7 = scalar_lea.hbm %s2926_s4, 256 }
 0x4df   : > { %p2115_p2 = scmp.ne.s32.totalorder %s2821_s6, %s2114_s27  ;;  %p2119_p4 = scmp.lt.u32.totalorder %s2821_s6, %s2926_s4 }
 0x4e0   : > { %p2120_p3 = scmp.lt.u32.totalorder %s2118_s7, %s2114_s27  ;;  %p2122_p10 = scmp.lt.u32.totalorder %s2114_s27, %s2821_s6 }
 0x4e1   : > { %p2116_p5 = pnand %p2115_p2, %p2927_p8 }
 0x4e2   : > { %p2121_p0 = por %p2120_p3, %p2119_p4 }
 0x4e3   : > { %p2117_p7 = pneg %p2116_p5 }
 0x4e4   : > { %p2123_p9 = por %p2122_p10, %p2121_p0 }
 0x4e6   : > { %p2124_p12 = pnand %p2123_p9, %p2117_p7 }
 0x4e8   : > { %2127 = shalt.err (!%p2124_p12)
}
 0x4e9   : > { %1918 = dma.vmem_to_hbm [thread:$0]  (%p2927_p8), %s1541_s29, 128, %s2821_s6, %s1526_s24  }
 0x4ea PF: > { %s2928_s23 = sld [smem:[#allocation12_spill]]  ;;  %s2929_s20 = sld [smem:[#allocation17_spill]] }
 0x4eb   : > { %s2930_s28 = sld [smem:[#allocation14_spill]] }
 0x4f0   : > { %s1552_s19 = sand.u32 1, %s2928_s23   ;;  %p2931_p1 = scmp.ne.s32.totalorder %s2929_s20, 0 }
 0x4f1   : > { %p2932_p6 = scmp.ge.s32.totalorder %s2930_s28, 2  ;;  %s1553_s30 = scalar_lea.sflag [#allocation4], %s1552_s19 }
 0x4f3   : > { %p1931_p13 = pnand %p2932_p6, %p2931_p1 }
 0x4f5   : > { %2169 = dma.done.wait (!%p1931_p13), %s1553_s30, 128  }
 0x4f6   : > { %2171 = vsyncadd (!%p1931_p13), %s1553_s30, 4294967168  ;;  %s26_s29 = sadd.s32 1, %s2930_s28   ;;  %s2933_s17 = sld [smem:[#allocation16_spill]] }
 0x4f7   : > { %p23_p11 = scmp.ge.s32.totalorder %s26_s29, 4   ;;  %s2934_s27 = sld [smem:[#allocation13_spill]] }
 0x4f8   : > { %s2935_s28 = sld [smem:[#allocation15_spill]]  ;;  %s2936_s24 = smov %s2178_s25 }
 0x4f9   : > { %s2937_s25 = smov %s2182_s26  ;;  %25 = sbr.rel (!%p23_p11) target bundleno = 17 (0x11), region = 144 }
 0x4fc   : > { %s2938_s26 = smov %s2933_s17 }
 0x500   :  { %1558 = vsyncpa [#allocation3], 1 }
 0x501   :  { %1560 = vsyncpa [#allocation3 + $0x1], 1 }
 0x502   :  { %1561 = vsyncpa [#allocation6], 1 }
 0x503   :  { %1563 = vsyncpa [#allocation6 + $0x1], 1 }
 0x504   :  { %1564 = vsyncpa [#allocation4], 1 }
 0x505   :  { %1566 = vsyncpa [#allocation4 + $0x1], 1 }

</bundles_post_ra>
